<compile_context>
chip_gen: v7x
topology: tpu7x:2x2x1
jax: 0.10.0
libtpu: 0.0.40
codegen_flags: <defaults>
</compile_context>

<pallas_src>
import functools

import jax
import jax.numpy as jnp
from jax import lax
from jax.experimental import pallas as pl
from jax.experimental.pallas import tpu as pltpu


def _round_up(x, m):
    return ((x + m - 1) // m) * m


def _vmem_limit_bytes():
    """Generation-aware scoped-VMEM limit.

    v5e/v6e have 128 MiB of VMEM per TensorCore, v7x has 64 MiB.  Query the
    capacity when available and clamp to a range that is safe everywhere
    (>= 32 MiB so v5e's 16 MiB default is raised, <= 56 MiB so we never exceed
    v7x's per-core physical VMEM even if the query reports the chip total).
    """
    cap = 64 * 2**20
    try:
        info = pltpu.get_tpu_info()
        cap = int(getattr(info, "vmem_capacity_bytes", cap)) or cap
    except Exception:
        pass
    return max(32 * 2**20, min(int(cap * 0.7), 56 * 2**20))


# ----------------------------------------------------------------------------
# Kernel 1: conv-as-matmul (bf16 MXU operands, f32 accumulator, bf16 output)
# ----------------------------------------------------------------------------
def _matmul_kernel(x_ref, w_ref, o_ref, acc_ref):
    k = pl.program_id(1)

    @pl.when(k == 0)
    def _():
        acc_ref[...] = jnp.zeros_like(acc_ref)

    acc_ref[...] += jnp.dot(x_ref[...], w_ref[...],
                            preferred_element_type=jnp.float32)

    @pl.when(k == pl.num_programs(1) - 1)
    def _():
        o_ref[...] = acc_ref[...].astype(o_ref.dtype)


def _pallas_matmul(x_col, w_col, *, vmem_limit):
    """x_col: [M, K] bf16, w_col: [K, Cp] bf16 (Cp % 128 == 0) -> [M, Cp] bf16."""
    M, K = x_col.shape
    Kw, Cp = w_col.shape
    assert Kw == K

    # K tiling: contract in a single block when it fits comfortably, otherwise
    # tile K with an f32 accumulator (grid axis 'arbitrary').  When tiling, pad
    # BOTH operands along K with zeros so ragged blocks never mix garbage rows
    # with real weights.
    tk = K if K <= 8192 else 4096
    Kp = _round_up(K, tk)
    if Kp != K:
        x_col = jnp.pad(x_col, ((0, 0), (0, Kp - K)))
        w_col = jnp.pad(w_col, ((0, Kp - K), (0, 0)))
    kt = Kp // tk

    # Largest M tile whose double-buffered blocks + accumulator fit the budget.
    budget = int(vmem_limit * 0.75)

    def est(t):
        return (2 * t * tk * 2          # x block (bf16, double buffered)
                + 2 * tk * Cp * 2       # w block (bf16, double buffered)
                + 2 * t * Cp * 2        # out block (bf16, double buffered)
                + t * Cp * 4)           # f32 accumulator scratch

    tm = 128
    for cand in (4096, 2048, 1024, 512, 256, 128):
        if est(cand) <= budget:
            tm = cand
            break
    tm = min(tm, _round_up(M, 8))

    return pl.pallas_call(
        _matmul_kernel,
        out_shape=jax.ShapeDtypeStruct((M, Cp), jnp.bfloat16),
        grid_spec=pltpu.PrefetchScalarGridSpec(
            num_scalar_prefetch=0,
            grid=(pl.cdiv(M, tm), kt),
            in_specs=[
                pl.BlockSpec((tm, tk), lambda i, k: (i, k)),
                pl.BlockSpec((tk, Cp), lambda i, k: (k, 0)),
            ],
            out_specs=pl.BlockSpec((tm, Cp), lambda i, k: (i, 0)),
            scratch_shapes=[pltpu.VMEM((tm, Cp), jnp.float32)],
        ),
        compiler_params=pltpu.CompilerParams(
            dimension_semantics=("parallel", "arbitrary"),
            vmem_limit_bytes=vmem_limit,
        ),
    )(x_col, w_col)


# ----------------------------------------------------------------------------
# Kernel 2: GroupNorm statistics, tiled over S (one-pass sum / sum-of-squares)
#   y block: (1, tS, Cp) bf16 -> per-sample raw sums (N, 2, Cp) f32
# ----------------------------------------------------------------------------
def _gn_stats_kernel(y_ref, o_ref, sum_ref, sq_ref, *, s_total, ts):
    s = pl.program_id(1)

    @pl.when(s == 0)
    def _():
        sum_ref[...] = jnp.zeros_like(sum_ref)
        sq_ref[...] = jnp.zeros_like(sq_ref)

    y = y_ref[0].astype(jnp.float32)                       # (tS, Cp)
    if s_total % ts != 0:
        # Ragged last tile: mask OOB rows so they never contribute to stats.
        rows = lax.broadcasted_iota(jnp.int32, y.shape, 0) + s * ts
        y = jnp.where(rows < s_total, y, 0.0)

    sum_ref[...] += jnp.sum(y, axis=0, keepdims=True)      # (1, Cp)
    sq_ref[...] += jnp.sum(y * y, axis=0, keepdims=True)   # (1, Cp)

    @pl.when(s == pl.num_programs(1) - 1)
    def _():
        o_ref[0] = jnp.concatenate([sum_ref[...], sq_ref[...]], axis=0)


def _pallas_gn_stats(y_nsc, *, ts, vmem_limit):
    N, S, Cp = y_nsc.shape
    kernel = functools.partial(_gn_stats_kernel, s_total=S, ts=ts)
    return pl.pallas_call(
        kernel,
        out_shape=jax.ShapeDtypeStruct((N, 2, Cp), jnp.float32),
        grid_spec=pltpu.PrefetchScalarGridSpec(
            num_scalar_prefetch=0,
            grid=(N, pl.cdiv(S, ts)),
            in_specs=[pl.BlockSpec((1, ts, Cp), lambda n, s: (n, s, 0))],
            out_specs=pl.BlockSpec((1, 2, Cp), lambda n, s: (n, 0, 0)),
            scratch_shapes=[pltpu.VMEM((1, Cp), jnp.float32),
                            pltpu.VMEM((1, Cp), jnp.float32)],
        ),
        compiler_params=pltpu.CompilerParams(
            dimension_semantics=("parallel", "arbitrary"),
            vmem_limit_bytes=vmem_limit,
        ),
    )(y_nsc)


# ----------------------------------------------------------------------------
# Kernel 3: GroupNorm apply + ReLU + layout fixup, tiled over S
#   y block (1, tS, Cp) bf16, scale/shift block (1, Cp, 2) f32
#   out block (1, Cout, tS) f32  (final NCDHW-compatible layout)
# ----------------------------------------------------------------------------
def _gn_norm_kernel(y_ref, ss_ref, o_ref):
    c_out = o_ref.shape[1]
    # Native-shape (tS, Cp) f32 transpose in VMEM, then drop the padded
    # channels *before* the normalize math so VPU work runs on Cout rows only.
    y_t = y_ref[0].astype(jnp.float32).T[:c_out, :]        # (Cout, tS)
    ss = ss_ref[0]                                         # (Cp, 2)
    scale = ss[:c_out, 0:1]                                # (Cout, 1)
    shift = ss[:c_out, 1:2]                                # (Cout, 1)
    o_ref[0] = jnp.maximum(y_t * scale + shift, 0.0).astype(o_ref.dtype)


def _pallas_gn_norm(y_nsc, scale_shift, *, cout, ts, vmem_limit):
    N, S, Cp = y_nsc.shape
    return pl.pallas_call(
        _gn_norm_kernel,
        out_shape=jax.ShapeDtypeStruct((N, cout, S), jnp.float32),
        grid_spec=pltpu.PrefetchScalarGridSpec(
            num_scalar_prefetch=0,
            grid=(N, pl.cdiv(S, ts)),
            in_specs=[
                pl.BlockSpec((1, ts, Cp), lambda n, s: (n, s, 0)),
                pl.BlockSpec((1, Cp, 2), lambda n, s: (n, 0, 0)),
            ],
            out_specs=pl.BlockSpec((1, cout, ts), lambda n, s: (n, 0, s)),
        ),
        compiler_params=pltpu.CompilerParams(
            dimension_semantics=("parallel", "parallel"),
            vmem_limit_bytes=vmem_limit,
        ),
    )(y_nsc, scale_shift)


def _pick_s_tile(S, Cp, Cout, vmem_limit):
    budget = int(vmem_limit * 0.75)

    def est(t):
        # Normalize pass is the tighter of the two GN passes:
        #   2x bf16 y block + 2x f32 out block + ~2.5 f32 in-kernel temporaries
        return 2 * t * Cp * 2 + 2 * Cout * t * 4 + int(2.5 * t * Cp * 4)

    ts = 128
    for cand in (16384, 8192, 4096, 2048, 1024, 512, 256, 128):
        if est(cand) <= budget:
            ts = cand
            break
    return min(ts, S)


def _group_scale_shift(stats, gamma, beta, *, cout, num_groups, s_total, eps, cp):
    """Tiny host-side finalize: raw per-channel sums -> per-channel scale/shift."""
    n = stats.shape[0]
    cg = cout // num_groups
    ch_sum = stats[:, 0, :cout]                            # (N, Cout)
    ch_sq = stats[:, 1, :cout]
    g_sum = ch_sum.reshape(n, num_groups, cg).sum(-1)      # (N, G)
    g_sq = ch_sq.reshape(n, num_groups, cg).sum(-1)
    cnt = float(cg * s_total)
    mean = g_sum / cnt
    var = jnp.maximum(g_sq / cnt - mean * mean, 0.0)
    inv = lax.rsqrt(var + eps)
    mean_c = jnp.repeat(mean, cg, axis=1)                  # (N, Cout)
    inv_c = jnp.repeat(inv, cg, axis=1)
    scale = inv_c * gamma[None, :]
    shift = beta[None, :] - mean_c * scale
    pad = cp - cout
    scale = jnp.pad(scale, ((0, 0), (0, pad)))
    shift = jnp.pad(shift, ((0, 0), (0, pad)))
    return jnp.stack([scale, shift], axis=-1)              # (N, Cp, 2)


# ----------------------------------------------------------------------------
# im2col for 3-D conv: channels-last, tap-major K, no giant transpose copy
# ----------------------------------------------------------------------------
def _im2col_3d(x_ncdhw, ksize, stride, padding, dilation):
    N, C, D, H, W = x_ncdhw.shape
    kD, kH, kW = ksize
    sD, sH, sW = stride
    pD, pH, pW = padding
    dD, dH, dW = dilation
    x = jnp.transpose(x_ncdhw, (0, 2, 3, 4, 1))            # NDHWC (small, one-time)
    xp = jnp.pad(x, ((0, 0), (pD, pD), (pH, pH), (pW, pW), (0, 0)))
    Do = (D + 2 * pD - dD * (kD - 1) - 1) // sD + 1
    Ho = (H + 2 * pH - dH * (kH - 1) - 1) // sH + 1
    Wo = (W + 2 * pW - dW * (kW - 1) - 1) // sW + 1
    taps = []
    for kd in range(kD):
        for kh in range(kH):
            for kw in range(kW):
                taps.append(xp[:,
                               kd * dD: kd * dD + (Do - 1) * sD + 1: sD,
                               kh * dH: kh * dH + (Ho - 1) * sH + 1: sH,
                               kw * dW: kw * dW + (Wo - 1) * sW + 1: sW, :])
    col = jnp.concatenate(taps, axis=-1)                   # (N, Do, Ho, Wo, k3*C)
    return col.reshape(N * Do * Ho * Wo, kD * kH * kW * C), (Do, Ho, Wo)


# ----------------------------------------------------------------------------
# BasicConv3d forward (NCDHW in, NCDHW out)
# ----------------------------------------------------------------------------
def basic_conv3d(x, conv_w, gn_gamma, gn_beta, *, stride, padding,
                 dilation=(1, 1, 1), num_groups=32, eps=1e-5):
    N = x.shape[0]
    Cout = conv_w.shape[0]
    ksize = tuple(conv_w.shape[2:])
    assert Cout % num_groups == 0, "GroupNorm(32, out_planes) needs out_planes % 32 == 0"
    vmem_limit = _vmem_limit_bytes()

    # im2col in bf16, channels-last, K ordered tap-major / channel-minor.
    x_col, (Do, Ho, Wo) = _im2col_3d(
        x.astype(jnp.bfloat16), ksize, stride, padding, dilation)
    M, K = x_col.shape
    S = Do * Ho * Wo

    # Lane-dense / MXU-friendly output channels.  Only pay 256-alignment when K
    # is large enough for the matmul to be MXU-bound (v6e/v7x are 256 wide).
    cp_align = 256 if K >= 2048 else 128
    Cp = _round_up(Cout, cp_align)
    w_col = jnp.transpose(conv_w, (2, 3, 4, 1, 0)).reshape(K, Cout)
    w_col = jnp.pad(w_col.astype(jnp.bfloat16), ((0, 0), (0, Cp - Cout)))

    y = _pallas_matmul(x_col, w_col, vmem_limit=vmem_limit)   # (M, Cp) bf16
    y = y.reshape(N, S, Cp)                                    # free reshape

    ts = _pick_s_tile(S, Cp, Cout, vmem_limit)
    stats = _pallas_gn_stats(y, ts=ts, vmem_limit=vmem_limit)  # (N, 2, Cp) raw sums
    scale_shift = _group_scale_shift(
        stats, gn_gamma.astype(jnp.float32), gn_beta.astype(jnp.float32),
        cout=Cout, num_groups=num_groups, s_total=S, eps=eps, cp=Cp)

    out = _pallas_gn_norm(y, scale_shift, cout=Cout, ts=ts,
                          vmem_limit=vmem_limit)               # (N, Cout, S) f32
    return out.reshape(N, Cout, Do, Ho, Wo)


# ----------------------------------------------------------------------------
# Pure-JAX reference for correctness checking
# ----------------------------------------------------------------------------
def _reference(x, conv_w, gamma, beta, stride, padding, dilation, num_groups, eps=1e-5):
    y = lax.conv_general_dilated(
        x, conv_w, window_strides=stride,
        padding=[(p, p) for p in padding],
        rhs_dilation=dilation,
        dimension_numbers=("NCDHW", "OIDHW", "NCDHW"),
        precision=lax.Precision.HIGHEST)
    N, C, D, H, W = y.shape
    yg = y.reshape(N, num_groups, -1)
    mean = yg.mean(axis=-1, keepdims=True)
    var = ((yg - mean) ** 2).mean(axis=-1, keepdims=True)
    yn = ((yg - mean) / jnp.sqrt(var + eps)).reshape(N, C, D, H, W)
    yn = yn * gamma.reshape(1, C, 1, 1, 1) + beta.reshape(1, C, 1, 1, 1)
    return jnp.maximum(yn, 0.0)


if __name__ == "__main__":
    # Small config consistent with BasicConv3d(in_planes=4, out_planes=32,
    # k=3, s=1, p=1): GroupNorm(32, out_planes) requires out_planes % 32 == 0.
    N, Cin, D, H, W = 2, 4, 8, 8, 8
    Cout = 32
    k, s, p, d = (3, 3, 3), (1, 1, 1), (1, 1, 1), (1, 1, 1)

    key = jax.random.PRNGKey(0)
    kx, kw, kg, kb = jax.random.split(key, 4)
    x = jax.random.normal(kx, (N, Cin, D, H, W), dtype=jnp.float32)
    conv_w = 0.1 * jax.random.normal(kw, (Cout, Cin, *k), dtype=jnp.float32)
    gamma = 1.0 + 0.1 * jax.random.normal(kg, (Cout,), dtype=jnp.float32)
    beta = 0.1 * jax.random.normal(kb, (Cout,), dtype=jnp.float32)

    fwd = jax.jit(lambda a, b, c, e: basic_conv3d(
        a, b, c, e, stride=s, padding=p, dilation=d, num_groups=32))
    out = jax.block_until_ready(fwd(x, conv_w, gamma, beta))

    # The Pallas path uses bf16 MXU operands *and* a bf16 conv intermediate
    # (halves the HBM traffic of the conv -> GN handoff), so max-abs tolerances
    # reflect bf16 quantization (~0.4% relative on post-conv activations that
    # GroupNorm then rescales to ~unit variance).
    x_bf = x.astype(jnp.bfloat16).astype(jnp.float32)
    w_bf = conv_w.astype(jnp.bfloat16).astype(jnp.float32)
    ref_bf = _reference(x_bf, w_bf, gamma, beta, s, p, d, 32)     # bf16-rounded operands
    ref_f32 = _reference(x, conv_w, gamma, beta, s, p, d, 32)     # full f32

    assert out.shape == ref_f32.shape == (N, Cout, D, H, W)
    err_bf = float(jnp.max(jnp.abs(out - ref_bf)))
    err_f32 = float(jnp.max(jnp.abs(out - ref_f32)))
    err_mean = float(jnp.mean(jnp.abs(out - ref_f32)))
    assert err_bf < 5e-2, err_bf
    assert err_f32 < 1e-1, err_f32
    assert err_mean < 5e-3, err_mean

    print("KERNEL_OK")
</pallas_src>

<mosaic_0001>
module attributes {stable_mosaic.version = 11 : i64} {
  func.func @_matmul_kernel(%arg0: i32, %arg1: i32, %arg2: memref<1024x108xbf16, #tpu.memory_space<vmem>>, %arg3: memref<108x128xbf16, #tpu.memory_space<vmem>>, %arg4: memref<1024x128xbf16, #tpu.memory_space<vmem>>, %arg5: memref<1024x128xf32, #tpu.memory_space<vmem>>) attributes {dimension_semantics = [#tpu.dimension_semantics<parallel>, #tpu.dimension_semantics<arbitrary>], iteration_bounds = array<i64: 1, 1>, scalar_prefetch = 0 : i64, scratch_operands = 1 : i64, tpu.core_type = #tpu.core_type<tc>, window_params = [{transform_indices = @transform_0, window_bounds = array<i64: 1024, 108>}, {transform_indices = @transform_1, window_bounds = array<i64: 108, 128>}, {transform_indices = @transform_2, window_bounds = array<i64: 1024, 128>}]} {
    %c0_i32 = arith.constant 0 : i32
    %0 = arith.cmpi eq, %arg1, %c0_i32 : i32
    %1 = arith.extui %0 : i1 to i32
    %c0_i32_0 = arith.constant 0 : i32
    %2 = arith.cmpi ne, %1, %c0_i32_0 : i32
    scf.if %2 {
      %cst_10 = arith.constant 0.000000e+00 : f32
      %12 = vector.broadcast %cst_10 : f32 to vector<1024x128xf32>
      %c0_11 = arith.constant 0 : index
      %c0_12 = arith.constant 0 : index
      %13 = vector.load %arg5[%c0_11, %c0_12] : memref<1024x128xf32, #tpu.memory_space<vmem>>, vector<1024x128xf32>
      tpu.vector_store %arg5[%c0_11, %c0_12], %12 {strides = array<i32>} : memref<1024x128xf32, #tpu.memory_space<vmem>>, vector<1024x128xf32>,
    } else {
    }
    %c0 = arith.constant 0 : index
    %c0_1 = arith.constant 0 : index
    %3 = vector.load %arg5[%c0, %c0_1] : memref<1024x128xf32, #tpu.memory_space<vmem>>, vector<1024x128xf32>
    %c0_2 = arith.constant 0 : index
    %c0_3 = arith.constant 0 : index
    %4 = vector.load %arg2[%c0_2, %c0_3] : memref<1024x108xbf16, #tpu.memory_space<vmem>>, vector<1024x108xbf16>
    %c0_4 = arith.constant 0 : index
    %c0_5 = arith.constant 0 : index
    %5 = vector.load %arg3[%c0_4, %c0_5] : memref<108x128xbf16, #tpu.memory_space<vmem>>, vector<108x128xbf16>
    %cst = arith.constant dense<0.000000e+00> : vector<1024x128xf32>
    %6 = tpu.matmul %4, %5, %cst {dimension_numbers = #tpu.dot_dimension_numbers<[1], [0], [0], [1], [0, 0, 1, 1], [], []>} : vector<1024x108xbf16>, vector<108x128xbf16>, vector<1024x128xf32> -> vector<1024x128xf32>
    %7 = arith.addf %3, %6 : vector<1024x128xf32>
    %c0_6 = arith.constant 0 : index
    %c0_7 = arith.constant 0 : index
    %8 = vector.load %arg5[%c0_6, %c0_7] : memref<1024x128xf32, #tpu.memory_space<vmem>>, vector<1024x128xf32>
    tpu.vector_store %arg5[%c0_6, %c0_7], %7 {strides = array<i32>} : memref<1024x128xf32, #tpu.memory_space<vmem>>, vector<1024x128xf32>,
    %c0_i32_8 = arith.constant 0 : i32
    %9 = arith.cmpi eq, %arg1, %c0_i32_8 : i32
    %10 = arith.extui %9 : i1 to i32
    %c0_i32_9 = arith.constant 0 : i32
    %11 = arith.cmpi ne, %10, %c0_i32_9 : i32
    scf.if %11 {
      %c0_10 = arith.constant 0 : index
      %c0_11 = arith.constant 0 : index
      %12 = vector.load %arg5[%c0_10, %c0_11] : memref<1024x128xf32, #tpu.memory_space<vmem>>, vector<1024x128xf32>
      %13 = arith.truncf %12 : vector<1024x128xf32> to vector<1024x128xbf16>
      %c0_12 = arith.constant 0 : index
      %c0_13 = arith.constant 0 : index
      %14 = vector.load %arg4[%c0_12, %c0_13] : memref<1024x128xbf16, #tpu.memory_space<vmem>>, vector<1024x128xbf16>
      tpu.vector_store %arg4[%c0_12, %c0_13], %13 {strides = array<i32>} : memref<1024x128xbf16, #tpu.memory_space<vmem>>, vector<1024x128xbf16>,
    } else {
    }
    return
  }
  func.func @transform_0(%arg0: i32, %arg1: i32) -> (i32, i32) {
    %c0_i32 = arith.constant 0 : i32
    return %arg0, %arg1 : i32, i32
  }
  func.func @transform_1(%arg0: i32, %arg1: i32) -> (i32, i32) {
    %c0_i32 = arith.constant 0 : i32
    %c0_i32_0 = arith.constant 0 : i32
    return %arg1, %c0_i32 : i32, i32
  }
  func.func @transform_2(%arg0: i32, %arg1: i32) -> (i32, i32) {
    %c0_i32 = arith.constant 0 : i32
    %c0_i32_0 = arith.constant 0 : i32
    return %arg0, %c0_i32 : i32, i32
  }
}

module attributes {stable_mosaic.version = 11 : i64} {
  func.func @_gn_stats_kernel(%arg0: i32, %arg1: i32, %arg2: memref<1x512x128xbf16, #tpu.memory_space<vmem>>, %arg3: memref<1x2x128xf32, #tpu.memory_space<vmem>>, %arg4: memref<1x128xf32, #tpu.memory_space<vmem>>, %arg5: memref<1x128xf32, #tpu.memory_space<vmem>>) attributes {dimension_semantics = [#tpu.dimension_semantics<parallel>, #tpu.dimension_semantics<arbitrary>], iteration_bounds = array<i64: 2, 1>, scalar_prefetch = 0 : i64, scratch_operands = 2 : i64, tpu.core_type = #tpu.core_type<tc>, window_params = [{transform_indices = @transform_0, window_bounds = array<i64: 1, 512, 128>}, {transform_indices = @transform_1, window_bounds = array<i64: 1, 2, 128>}]} {
    %c0_i32 = arith.constant 0 : i32
    %0 = arith.cmpi eq, %arg1, %c0_i32 : i32
    %1 = arith.extui %0 : i1 to i32
    %c0_i32_0 = arith.constant 0 : i32
    %2 = arith.cmpi ne, %1, %c0_i32_0 : i32
    scf.if %2 {
      %cst_14 = arith.constant 0.000000e+00 : f32
      %20 = vector.broadcast %cst_14 : f32 to vector<1x128xf32>
      %c0_15 = arith.constant 0 : index
      %c0_16 = arith.constant 0 : index
      %21 = vector.load %arg4[%c0_15, %c0_16] : memref<1x128xf32, #tpu.memory_space<vmem>>, vector<1x128xf32>
      tpu.vector_store %arg4[%c0_15, %c0_16], %20 {strides = array<i32>} : memref<1x128xf32, #tpu.memory_space<vmem>>, vector<1x128xf32>,
      %cst_17 = arith.constant 0.000000e+00 : f32
      %22 = vector.broadcast %cst_17 : f32 to vector<1x128xf32>
      %c0_18 = arith.constant 0 : index
      %c0_19 = arith.constant 0 : index
      %23 = vector.load %arg5[%c0_18, %c0_19] : memref<1x128xf32, #tpu.memory_space<vmem>>, vector<1x128xf32>
      tpu.vector_store %arg5[%c0_18, %c0_19], %22 {strides = array<i32>} : memref<1x128xf32, #tpu.memory_space<vmem>>, vector<1x128xf32>,
    } else {
    }
    %c0 = arith.constant 0 : index
    %c0_1 = arith.constant 0 : index
    %c0_2 = arith.constant 0 : index
    %3 = vector.load %arg2[%c0, %c0_1, %c0_2] : memref<1x512x128xbf16, #tpu.memory_space<vmem>>, vector<1x512x128xbf16>
    %4 = vector.shape_cast %3 : vector<1x512x128xbf16> to vector<512x128xbf16>
    %5 = arith.extf %4 : vector<512x128xbf16> to vector<512x128xf32>
    %c0_3 = arith.constant 0 : index
    %c0_4 = arith.constant 0 : index
    %6 = vector.load %arg4[%c0_3, %c0_4] : memref<1x128xf32, #tpu.memory_space<vmem>>, vector<1x128xf32>
    %cst = arith.constant dense<0.000000e+00> : vector<128xf32>
    %7 = vector.multi_reduction <add>, %5, %cst [0] : vector<512x128xf32> to vector<128xf32>
    %8 = vector.shape_cast %7 : vector<128xf32> to vector<1x128xf32>
    %9 = arith.addf %6, %8 : vector<1x128xf32>
    %c0_5 = arith.constant 0 : index
    %c0_6 = arith.constant 0 : index
    %10 = vector.load %arg4[%c0_5, %c0_6] : memref<1x128xf32, #tpu.memory_space<vmem>>, vector<1x128xf32>
    tpu.vector_store %arg4[%c0_5, %c0_6], %9 {strides = array<i32>} : memref<1x128xf32, #tpu.memory_space<vmem>>, vector<1x128xf32>,
    %c0_7 = arith.constant 0 : index
    %c0_8 = arith.constant 0 : index
    %11 = vector.load %arg5[%c0_7, %c0_8] : memref<1x128xf32, #tpu.memory_space<vmem>>, vector<1x128xf32>
    %12 = arith.mulf %5, %5 : vector<512x128xf32>
    %cst_9 = arith.constant dense<0.000000e+00> : vector<128xf32>
    %13 = vector.multi_reduction <add>, %12, %cst_9 [0] : vector<512x128xf32> to vector<128xf32>
    %14 = vector.shape_cast %13 : vector<128xf32> to vector<1x128xf32>
    %15 = arith.addf %11, %14 : vector<1x128xf32>
    %c0_10 = arith.constant 0 : index
    %c0_11 = arith.constant 0 : index
    %16 = vector.load %arg5[%c0_10, %c0_11] : memref<1x128xf32, #tpu.memory_space<vmem>>, vector<1x128xf32>
    tpu.vector_store %arg5[%c0_10, %c0_11], %15 {strides = array<i32>} : memref<1x128xf32, #tpu.memory_space<vmem>>, vector<1x128xf32>,
    %c0_i32_12 = arith.constant 0 : i32
    %17 = arith.cmpi eq, %arg1, %c0_i32_12 : i32
    %18 = arith.extui %17 : i1 to i32
    %c0_i32_13 = arith.constant 0 : i32
    %19 = arith.cmpi ne, %18, %c0_i32_13 : i32
    scf.if %19 {
      %c0_14 = arith.constant 0 : index
      %c0_15 = arith.constant 0 : index
      %20 = vector.load %arg4[%c0_14, %c0_15] : memref<1x128xf32, #tpu.memory_space<vmem>>, vector<1x128xf32>
      %c0_16 = arith.constant 0 : index
      %c0_17 = arith.constant 0 : index
      %21 = vector.load %arg5[%c0_16, %c0_17] : memref<1x128xf32, #tpu.memory_space<vmem>>, vector<1x128xf32>
      %22 = tpu.concatenate %20, %21 in 0 : vector<1x128xf32>, vector<1x128xf32> -> vector<2x128xf32>
      %c0_18 = arith.constant 0 : index
      %c0_19 = arith.constant 0 : index
      %c0_20 = arith.constant 0 : index
      %23 = vector.load %arg3[%c0_18, %c0_19, %c0_20] : memref<1x2x128xf32, #tpu.memory_space<vmem>>, vector<1x2x128xf32>
      %24 = vector.shape_cast %23 : vector<1x2x128xf32> to vector<2x128xf32>
      %25 = vector.shape_cast %22 : vector<2x128xf32> to vector<1x2x128xf32>
      tpu.vector_store %arg3[%c0_18, %c0_19, %c0_20], %25 {strides = array<i32>} : memref<1x2x128xf32, #tpu.memory_space<vmem>>, vector<1x2x128xf32>,
    } else {
    }
    return
  }
  func.func @transform_0(%arg0: i32, %arg1: i32) -> (i32, i32, i32) {
    %c0_i32 = arith.constant 0 : i32
    %c0_i32_0 = arith.constant 0 : i32
    return %arg0, %arg1, %c0_i32 : i32, i32, i32
  }
  func.func @transform_1(%arg0: i32, %arg1: i32) -> (i32, i32, i32) {
    %c0_i32 = arith.constant 0 : i32
    %c0_i32_0 = arith.constant 0 : i32
    %c0_i32_1 = arith.constant 0 : i32
    return %arg0, %c0_i32, %c0_i32_0 : i32, i32, i32
  }
}

module attributes {stable_mosaic.version = 11 : i64} {
  func.func @_gn_norm_kernel(%arg0: i32, %arg1: i32, %arg2: memref<1x512x128xbf16, #tpu.memory_space<vmem>>, %arg3: memref<1x128x2xf32, #tpu.memory_space<vmem>>, %arg4: memref<1x32x512xf32, #tpu.memory_space<vmem>>) attributes {dimension_semantics = [#tpu.dimension_semantics<parallel>, #tpu.dimension_semantics<parallel>], iteration_bounds = array<i64: 2, 1>, scalar_prefetch = 0 : i64, scratch_operands = 0 : i64, tpu.core_type = #tpu.core_type<tc>, window_params = [{transform_indices = @transform_0, window_bounds = array<i64: 1, 512, 128>}, {transform_indices = @transform_1, window_bounds = array<i64: 1, 128, 2>}, {transform_indices = @transform_2, window_bounds = array<i64: 1, 32, 512>}]} {
    %c0 = arith.constant 0 : index
    %c0_0 = arith.constant 0 : index
    %c0_1 = arith.constant 0 : index
    %0 = vector.load %arg2[%c0, %c0_0, %c0_1] : memref<1x512x128xbf16, #tpu.memory_space<vmem>>, vector<1x512x128xbf16>
    %1 = vector.shape_cast %0 : vector<1x512x128xbf16> to vector<512x128xbf16>
    %2 = arith.extf %1 : vector<512x128xbf16> to vector<512x128xf32>
    %3 = tpu.transpose %2, [1, 0] : vector<512x128xf32> -> vector<128x512xf32>
    %4 = vector.extract_strided_slice %3 {offsets = [0, 0], sizes = [32, 512], strides = [1, 1]} : vector<128x512xf32> to vector<32x512xf32>
    %c0_2 = arith.constant 0 : index
    %c0_3 = arith.constant 0 : index
    %c0_4 = arith.constant 0 : index
    %5 = vector.load %arg3[%c0_2, %c0_3, %c0_4] : memref<1x128x2xf32, #tpu.memory_space<vmem>>, vector<1x128x2xf32>
    %6 = vector.shape_cast %5 : vector<1x128x2xf32> to vector<128x2xf32>
    %7 = vector.extract_strided_slice %6 {offsets = [0, 0], sizes = [32, 1], strides = [1, 1]} : vector<128x2xf32> to vector<32x1xf32>
    %8 = vector.extract_strided_slice %6 {offsets = [0, 1], sizes = [32, 1], strides = [1, 1]} : vector<128x2xf32> to vector<32x1xf32>
    %9 = vector.broadcast %7 : vector<32x1xf32> to vector<32x512xf32>
    %10 = arith.mulf %4, %9 : vector<32x512xf32>
    %11 = vector.broadcast %8 : vector<32x1xf32> to vector<32x512xf32>
    %12 = arith.addf %10, %11 : vector<32x512xf32>
    %cst = arith.constant 0.000000e+00 : f32
    %13 = vector.broadcast %cst : f32 to vector<32x512xf32>
    %14 = arith.maximumf %12, %13 : vector<32x512xf32>
    %c0_5 = arith.constant 0 : index
    %c0_6 = arith.constant 0 : index
    %c0_7 = arith.constant 0 : index
    %15 = vector.load %arg4[%c0_5, %c0_6, %c0_7] : memref<1x32x512xf32, #tpu.memory_space<vmem>>, vector<1x32x512xf32>
    %16 = vector.shape_cast %15 : vector<1x32x512xf32> to vector<32x512xf32>
    %17 = vector.shape_cast %14 : vector<32x512xf32> to vector<1x32x512xf32>
    tpu.vector_store %arg4[%c0_5, %c0_6, %c0_7], %17 {strides = array<i32>} : memref<1x32x512xf32, #tpu.memory_space<vmem>>, vector<1x32x512xf32>,
    return
  }
  func.func @transform_0(%arg0: i32, %arg1: i32) -> (i32, i32, i32) {
    %c0_i32 = arith.constant 0 : i32
    %c0_i32_0 = arith.constant 0 : i32
    return %arg0, %arg1, %c0_i32 : i32, i32, i32
  }
  func.func @transform_1(%arg0: i32, %arg1: i32) -> (i32, i32, i32) {
    %c0_i32 = arith.constant 0 : i32
    %c0_i32_0 = arith.constant 0 : i32
    %c0_i32_1 = arith.constant 0 : i32
    return %arg0, %c0_i32, %c0_i32_0 : i32, i32, i32
  }
  func.func @transform_2(%arg0: i32, %arg1: i32) -> (i32, i32, i32) {
    %c0_i32 = arith.constant 0 : i32
    %c0_i32_0 = arith.constant 0 : i32
    return %arg0, %c0_i32, %arg1 : i32, i32, i32
  }
}

</mosaic_0001>

<bundles_post_ra>
// kernel: _lambda_.4
= control target key start
LH: loop header
LB: loop body
LE: loop exit
PB: predicated region body
PF: predicated region fallthrough
CT: control target
= control target key end

     0   :  { %s797_s6 = smov 0   ;;  %s799_s7 = smov 0   ;;  %s868_s0 = inlined_call_operand.vmem [shape: bf16[2,512,128], index: 0, kind: input, shape index: {}]   ;;  %s869_s1 = inlined_call_operand.vmem [shape: f32[2,2,128], index: 1, kind: output, shape index: {}]  }
   0x1   :  { %s801_s8 = smov 0  }
   0x2 LB: > { %s23_s9 = sadd.s32 1, %s780_s7  ;;  %p570_p0 = scmp.ge.s32.totalorder %s784_s8, 1  ;;  %s784_s8 = sphi %s801_s8, %s11_s8   ;;  %s780_s7 = sphi %s799_s7, %s871_s7   ;;  %s776_s6 = sphi %s797_s6, %s870_s6  }
   0x3   : > { %p25_p1 = scmp.ge.s32.totalorder %s23_s9, 2  ;;  %p106_p2 = scmp.lt.s32.totalorder %s784_s8, 3 }
   0x5   : > { %s873_s9 = smov (%p25_p1, %s23_s9), 0  ;;  %p107_p3 = pnand %p570_p0, %p106_p2 }
   0x6   : > { %v786_v0 = vmov (!%p107_p3), 0.0   ;;  %p130_p4 = scmp.lt.s32.totalorder (!%p107_p3), %s776_s6, 1  ;;  %vm496_vm0 = vcmask (!%p107_p3), 1040384  }
   0x7   : > { %110 = sbr.rel (%p107_p3) target bundleno = 173 (0xad), region = 24  ;;  %147 = vst [vmem:[#allocation2] sm:$0x1] (!%p107_p3), %v786_v0  ;;  %148 = vst [vmem:[#allocation3] sm:$0x1] (!%p107_p3), %v786_v0 }
   0xe   : > { %s875_s6 = smov (!%p130_p4, %s776_s6), 1 }
   0xf   : > { %s577_s10 = sshll.u32 %s875_s6, 8  ;;  %s573_s14 = sshll.u32 %s875_s6, 1 }
  0x10   : > { %s821_s13 = scalar_lea.vmem %s868_s0, %s577_s10  ;;  %s142_s17 = scalar_lea.vmem %s869_s1, %s573_s14 }
  0x11   : > { %v579_v1 = vld [vmem:[%s821_s13] sm:$0xff]   ;;  %v706_v2 = vld [vmem:[%s821_s13 + $0x8] sm:$0xff]   ;;  %v707_v7 = vld [vmem:[%s821_s13 + $0x10] sm:$0xff]  }
  0x12   : > { %v580_v3 = vunpack.c.l.bf16 %v579_v1  ;;  %v581_v4 = vunpack.c.h.bf16 %v579_v1  ;;  %v584_v5 = vunpack.c.l.bf16 %v706_v2  ;;  %v585_v8 = vunpack.c.h.bf16 %v706_v2  ;;  %v708_v12 = vld [vmem:[%s821_s13 + $0x18] sm:$0xff]   ;;  %v709_v17 = vld [vmem:[%s821_s13 + $0x20] sm:$0xff]   ;;  %v710_v22 = vld [vmem:[%s821_s13 + $0x28] sm:$0xff]  }
  0x13   : > { %v588_v10 = vunpack.c.l.bf16 %v707_v7  ;;  %v589_v13 = vunpack.c.h.bf16 %v707_v7  ;;  %v592_v15 = vunpack.c.l.bf16 %v708_v12  ;;  %v593_v18 = vunpack.c.h.bf16 %v708_v12  ;;  %v711_v30 = vld [vmem:[%s821_s13 + $0x30] sm:$0xff]   ;;  %v712_v39 = vld [vmem:[%s821_s13 + $0x38] sm:$0xff]   ;;  %v713_v48 = vld [vmem:[%s821_s13 + $0x40] sm:$0xff]  }
  0x14   : > { %v278_v6 = vadd.f32 %v581_v4, %v580_v3  ;;  %v596_v20 = vunpack.c.l.bf16 %v709_v17  ;;  %v597_v23 = vunpack.c.h.bf16 %v709_v17  ;;  %v350_v25 = vmul.f32 %v580_v3, %v580_v3  ;;  %v714_v57 = vld [vmem:[%s821_s13 + $0x48] sm:$0xff]   ;;  %v715_v2 = vld [vmem:[%s821_s13 + $0x50] sm:$0xff]  }
  0x15   : > { %v351_v26 = vmul.f32 %v581_v4, %v581_v4  ;;  %v600_v27 = vunpack.c.l.bf16 %v710_v22  ;;  %v352_v29 = vmul.f32 %v584_v5, %v584_v5  ;;  %v601_v31 = vunpack.c.h.bf16 %v710_v22 }
  0x16   : > { %v279_v9 = vadd.f32 %v584_v5, %v278_v6  ;;  %v353_v33 = vmul.f32 %v585_v8, %v585_v8  ;;  %v604_v35 = vunpack.c.l.bf16 %v711_v30  ;;  %v354_v37 = vmul.f32 %v588_v10, %v588_v10 }
  0x17   : > { %v414_v34 = vadd.f32 %v351_v26, %v350_v25  ;;  %v605_v40 = vunpack.c.h.bf16 %v711_v30  ;;  %v355_v42 = vmul.f32 %v589_v13, %v589_v13  ;;  %v608_v44 = vunpack.c.l.bf16 %v712_v39 }
  0x18   : > { %v280_v11 = vadd.f32 %v585_v8, %v279_v9  ;;  %v356_v46 = vmul.f32 %v592_v15, %v592_v15  ;;  %v609_v49 = vunpack.c.h.bf16 %v712_v39  ;;  %v357_v51 = vmul.f32 %v593_v18, %v593_v18 }
  0x19   : > { %v415_v38 = vadd.f32 %v414_v34, %v352_v29  ;;  %v612_v53 = vunpack.c.l.bf16 %v713_v48  ;;  %v358_v55 = vmul.f32 %v596_v20, %v596_v20  ;;  %v613_v58 = vunpack.c.h.bf16 %v713_v48  ;;  %v718_v29 = vld [vmem:[%s821_s13 + $0x68] sm:$0xff]  }
  0x1a   : > { %v281_v14 = vadd.f32 %v588_v10, %v280_v11  ;;  %v359_v60 = vmul.f32 %v597_v23, %v597_v23  ;;  %v616_v62 = vunpack.c.l.bf16 %v714_v57  ;;  %v360_v0 = vmul.f32 %v600_v27, %v600_v27  ;;  %v716_v11 = vld [vmem:[%s821_s13 + $0x58] sm:$0xff]  }
  0x1b   : > { %v416_v43 = vadd.f32 %v415_v38, %v353_v33  ;;  %v617_v3 = vunpack.c.h.bf16 %v714_v57  ;;  %v361_v5 = vmul.f32 %v601_v31, %v601_v31  ;;  %v620_v7 = vunpack.c.l.bf16 %v715_v2  ;;  %v719_v38 = vld [vmem:[%s821_s13 + $0x70] sm:$0xff]  }
  0x1c   : > { %v282_v16 = vadd.f32 %v589_v13, %v281_v14  ;;  %v362_v9 = vmul.f32 %v604_v35, %v604_v35  ;;  %v621_v12 = vunpack.c.h.bf16 %v715_v2  ;;  %v363_v14 = vmul.f32 %v605_v40, %v605_v40 }
  0x1d   : > { %v417_v47 = vadd.f32 %v416_v43, %v354_v37  ;;  %v632_v34 = vunpack.c.l.bf16 %v718_v29  ;;  %v633_v39 = vunpack.c.h.bf16 %v718_v29  ;;  %v636_v43 = vunpack.c.l.bf16 %v719_v38 }
  0x1e   : > { %v283_v19 = vadd.f32 %v592_v15, %v282_v16  ;;  %v624_v16 = vunpack.c.l.bf16 %v716_v11  ;;  %v637_v48 = vunpack.c.h.bf16 %v719_v38 }
  0x1f   : > { %v418_v52 = vadd.f32 %v417_v47, %v355_v42  ;;  %v720_v47 = vld [vmem:[%s821_s13 + $0x78] sm:$0xff]  }
  0x20   : > { %v284_v21 = vadd.f32 %v593_v18, %v283_v19  ;;  %v364_v18 = vmul.f32 %v608_v44, %v608_v44  ;;  %v641_v57 = vunpack.c.h.bf16 %v720_v47 }
  0x21   : > { %v419_v56 = vadd.f32 %v418_v52, %v356_v46  ;;  %v640_v52 = vunpack.c.l.bf16 %v720_v47 }
  0x22   : > { %v285_v24 = vadd.f32 %v596_v20, %v284_v21  ;;  %v717_v20 = vld [vmem:[%s821_s13 + $0x60] sm:$0xff]   ;;  %v625_v21 = vunpack.c.h.bf16 %v716_v11 }
  0x23   : > { %v420_v61 = vadd.f32 %v419_v56, %v357_v51  ;;  %v628_v25 = vunpack.c.l.bf16 %v717_v20  ;;  %v629_v30 = vunpack.c.h.bf16 %v717_v20  ;;  %v721_v56 = vld [vmem:[%s821_s13 + $0x80] sm:$0xff]  }
  0x24   : > { %v286_v28 = vadd.f32 %v597_v23, %v285_v24  ;;  %v365_v23 = vmul.f32 %v609_v49, %v609_v49  ;;  %v645_v2 = vunpack.c.h.bf16 %v721_v56 }
  0x25   : > { %v421_v1 = vadd.f32 %v420_v61, %v358_v55  ;;  %v644_v61 = vunpack.c.l.bf16 %v721_v56 }
  0x26   : > { %v287_v32 = vadd.f32 %v600_v27, %v286_v28  ;;  %v366_v27 = vmul.f32 %v612_v53, %v612_v53 }
  0x27   : > { %v422_v6 = vadd.f32 %v421_v1, %v359_v60  ;;  %v722_v1 = vld [vmem:[%s821_s13 + $0x88] sm:$0xff]  }
  0x28   : > { %v288_v36 = vadd.f32 %v601_v31, %v287_v32  ;;  %v367_v32 = vmul.f32 %v613_v58, %v613_v58  ;;  %v649_v11 = vunpack.c.h.bf16 %v722_v1 }
  0x29   : > { %v423_v10 = vadd.f32 %v422_v6, %v360_v0  ;;  %v648_v6 = vunpack.c.l.bf16 %v722_v1 }
  0x2a   : > { %v289_v41 = vadd.f32 %v604_v35, %v288_v36  ;;  %v368_v36 = vmul.f32 %v616_v62, %v616_v62 }
  0x2b   : > { %v424_v15 = vadd.f32 %v423_v10, %v361_v5  ;;  %v723_v10 = vld [vmem:[%s821_s13 + $0x90] sm:$0xff]  }
  0x2c   : > { %v290_v45 = vadd.f32 %v605_v40, %v289_v41  ;;  %v369_v41 = vmul.f32 %v617_v3, %v617_v3  ;;  %v653_v20 = vunpack.c.h.bf16 %v723_v10 }
  0x2d   : > { %v425_v19 = vadd.f32 %v424_v15, %v362_v9  ;;  %v652_v15 = vunpack.c.l.bf16 %v723_v10 }
  0x2e   : > { %v291_v50 = vadd.f32 %v608_v44, %v290_v45  ;;  %v370_v45 = vmul.f32 %v620_v7, %v620_v7 }
  0x2f   : > { %v426_v24 = vadd.f32 %v425_v19, %v363_v14  ;;  %v724_v19 = vld [vmem:[%s821_s13 + $0x98] sm:$0xff]  }
  0x30   : > { %v292_v54 = vadd.f32 %v609_v49, %v291_v50  ;;  %v371_v50 = vmul.f32 %v621_v12, %v621_v12  ;;  %v657_v29 = vunpack.c.h.bf16 %v724_v19 }
  0x31   : > { %v427_v28 = vadd.f32 %v426_v24, %v364_v18  ;;  %v656_v24 = vunpack.c.l.bf16 %v724_v19 }
  0x32   : > { %v293_v59 = vadd.f32 %v612_v53, %v292_v54  ;;  %v372_v54 = vmul.f32 %v624_v16, %v624_v16 }
  0x33   : > { %v428_v33 = vadd.f32 %v427_v28, %v365_v23  ;;  %v725_v28 = vld [vmem:[%s821_s13 + $0xa0] sm:$0xff]  }
  0x34   : > { %v294_v63 = vadd.f32 %v613_v58, %v293_v59  ;;  %v373_v59 = vmul.f32 %v625_v21, %v625_v21  ;;  %v661_v38 = vunpack.c.h.bf16 %v725_v28 }
  0x35   : > { %v429_v37 = vadd.f32 %v428_v33, %v366_v27  ;;  %v660_v33 = vunpack.c.l.bf16 %v725_v28 }
  0x36   : > { %v295_v4 = vadd.f32 %v616_v62, %v294_v63  ;;  %v374_v63 = vmul.f32 %v628_v25, %v628_v25 }
  0x37   : > { %v430_v42 = vadd.f32 %v429_v37, %v367_v32  ;;  %v726_v37 = vld [vmem:[%s821_s13 + $0xa8] sm:$0xff]  }
  0x38   : > { %v296_v8 = vadd.f32 %v617_v3, %v295_v4  ;;  %v375_v4 = vmul.f32 %v629_v30, %v629_v30  ;;  %v665_v47 = vunpack.c.h.bf16 %v726_v37 }
  0x39   : > { %v431_v46 = vadd.f32 %v430_v42, %v368_v36  ;;  %v664_v42 = vunpack.c.l.bf16 %v726_v37 }
  0x3a   : > { %v297_v13 = vadd.f32 %v620_v7, %v296_v8  ;;  %v376_v8 = vmul.f32 %v632_v34, %v632_v34 }
  0x3b   : > { %v432_v51 = vadd.f32 %v431_v46, %v369_v41  ;;  %v727_v46 = vld [vmem:[%s821_s13 + $0xb0] sm:$0xff]  }
  0x3c   : > { %v298_v17 = vadd.f32 %v621_v12, %v297_v13  ;;  %v377_v13 = vmul.f32 %v633_v39, %v633_v39  ;;  %v669_v56 = vunpack.c.h.bf16 %v727_v46 }
  0x3d   : > { %v433_v55 = vadd.f32 %v432_v51, %v370_v45  ;;  %v668_v51 = vunpack.c.l.bf16 %v727_v46 }
  0x3e   : > { %v299_v22 = vadd.f32 %v624_v16, %v298_v17  ;;  %v378_v17 = vmul.f32 %v636_v43, %v636_v43 }
  0x3f   : > { %v434_v60 = vadd.f32 %v433_v55, %v371_v50  ;;  %v728_v55 = vld [vmem:[%s821_s13 + $0xb8] sm:$0xff]  }
  0x40   : > { %v300_v26 = vadd.f32 %v625_v21, %v299_v22  ;;  %v379_v22 = vmul.f32 %v637_v48, %v637_v48  ;;  %v673_v1 = vunpack.c.h.bf16 %v728_v55 }
  0x41   : > { %v435_v0 = vadd.f32 %v434_v60, %v372_v54  ;;  %v672_v60 = vunpack.c.l.bf16 %v728_v55 }
  0x42   : > { %v301_v31 = vadd.f32 %v628_v25, %v300_v26  ;;  %v380_v26 = vmul.f32 %v640_v52, %v640_v52 }
  0x43   : > { %v436_v5 = vadd.f32 %v435_v0, %v373_v59  ;;  %v729_v0 = vld [vmem:[%s821_s13 + $0xc0] sm:$0xff]  }
  0x44   : > { %v302_v35 = vadd.f32 %v629_v30, %v301_v31  ;;  %v381_v31 = vmul.f32 %v641_v57, %v641_v57  ;;  %v677_v10 = vunpack.c.h.bf16 %v729_v0 }
  0x45   : > { %v437_v9 = vadd.f32 %v436_v5, %v374_v63  ;;  %v676_v5 = vunpack.c.l.bf16 %v729_v0 }
  0x46   : > { %v303_v40 = vadd.f32 %v632_v34, %v302_v35  ;;  %v382_v35 = vmul.f32 %v644_v61, %v644_v61 }
  0x47   : > { %v438_v14 = vadd.f32 %v437_v9, %v375_v4  ;;  %v730_v9 = vld [vmem:[%s821_s13 + $0xc8] sm:$0xff]  }
  0x48   : > { %v304_v44 = vadd.f32 %v633_v39, %v303_v40  ;;  %v383_v40 = vmul.f32 %v645_v2, %v645_v2  ;;  %v681_v19 = vunpack.c.h.bf16 %v730_v9 }
  0x49   : > { %v439_v18 = vadd.f32 %v438_v14, %v376_v8  ;;  %v680_v14 = vunpack.c.l.bf16 %v730_v9 }
  0x4a   : > { %v305_v49 = vadd.f32 %v636_v43, %v304_v44  ;;  %v384_v44 = vmul.f32 %v648_v6, %v648_v6 }
  0x4b   : > { %v440_v23 = vadd.f32 %v439_v18, %v377_v13  ;;  %v731_v18 = vld [vmem:[%s821_s13 + $0xd0] sm:$0xff]  }
  0x4c   : > { %v306_v53 = vadd.f32 %v637_v48, %v305_v49  ;;  %v385_v49 = vmul.f32 %v649_v11, %v649_v11  ;;  %v685_v28 = vunpack.c.h.bf16 %v731_v18 }
  0x4d   : > { %v441_v27 = vadd.f32 %v440_v23, %v378_v17  ;;  %v684_v23 = vunpack.c.l.bf16 %v731_v18 }
  0x4e   : > { %v307_v58 = vadd.f32 %v640_v52, %v306_v53  ;;  %v386_v53 = vmul.f32 %v652_v15, %v652_v15 }
  0x4f   : > { %v442_v32 = vadd.f32 %v441_v27, %v379_v22  ;;  %v732_v27 = vld [vmem:[%s821_s13 + $0xd8] sm:$0xff]  }
  0x50   : > { %v308_v62 = vadd.f32 %v641_v57, %v307_v58  ;;  %v387_v58 = vmul.f32 %v653_v20, %v653_v20  ;;  %v689_v37 = vunpack.c.h.bf16 %v732_v27 }
  0x51   : > { %v443_v36 = vadd.f32 %v442_v32, %v380_v26  ;;  %v688_v32 = vunpack.c.l.bf16 %v732_v27 }
  0x52   : > { %v309_v3 = vadd.f32 %v644_v61, %v308_v62  ;;  %v388_v62 = vmul.f32 %v656_v24, %v656_v24 }
  0x53   : > { %v444_v41 = vadd.f32 %v443_v36, %v381_v31  ;;  %v733_v36 = vld [vmem:[%s821_s13 + $0xe0] sm:$0xff]  }
  0x54   : > { %v310_v7 = vadd.f32 %v645_v2, %v309_v3  ;;  %v389_v3 = vmul.f32 %v657_v29, %v657_v29  ;;  %v693_v46 = vunpack.c.h.bf16 %v733_v36 }
  0x55   : > { %v445_v45 = vadd.f32 %v444_v41, %v382_v35  ;;  %v692_v41 = vunpack.c.l.bf16 %v733_v36 }
  0x56   : > { %v311_v12 = vadd.f32 %v648_v6, %v310_v7  ;;  %v390_v7 = vmul.f32 %v660_v33, %v660_v33 }
  0x57   : > { %v446_v50 = vadd.f32 %v445_v45, %v383_v40  ;;  %v734_v45 = vld [vmem:[%s821_s13 + $0xe8] sm:$0xff]  }
  0x58   : > { %v312_v16 = vadd.f32 %v649_v11, %v311_v12  ;;  %v391_v12 = vmul.f32 %v661_v38, %v661_v38  ;;  %v697_v55 = vunpack.c.h.bf16 %v734_v45 }
  0x59   : > { %v447_v54 = vadd.f32 %v446_v50, %v384_v44  ;;  %v696_v50 = vunpack.c.l.bf16 %v734_v45 }
  0x5a   : > { %v313_v21 = vadd.f32 %v652_v15, %v312_v16  ;;  %v392_v16 = vmul.f32 %v664_v42, %v664_v42 }
  0x5b   : > { %v448_v59 = vadd.f32 %v447_v54, %v385_v49  ;;  %v735_v54 = vld [vmem:[%s821_s13 + $0xf0] sm:$0xff]  }
  0x5c   : > { %v314_v25 = vadd.f32 %v653_v20, %v313_v21  ;;  %v393_v21 = vmul.f32 %v665_v47, %v665_v47  ;;  %v701_v0 = vunpack.c.h.bf16 %v735_v54 }
  0x5d   : > { %v449_v63 = vadd.f32 %v448_v59, %v386_v53  ;;  %v700_v59 = vunpack.c.l.bf16 %v735_v54 }
  0x5e   : > { %v315_v30 = vadd.f32 %v656_v24, %v314_v25  ;;  %v394_v25 = vmul.f32 %v668_v51, %v668_v51 }
  0x5f   : > { %v450_v4 = vadd.f32 %v449_v63, %v387_v58  ;;  %v736_v63 = vld [vmem:[%s821_s13 + $0xf8] sm:$0xff]  }
  0x60   : > { %v316_v34 = vadd.f32 %v657_v29, %v315_v30  ;;  %v395_v30 = vmul.f32 %v669_v56, %v669_v56 }
  0x61   : > { %v451_v8 = vadd.f32 %v450_v4, %v388_v62  ;;  %v704_v4 = vunpack.c.l.bf16 %v736_v63 }
  0x62   : > { %v317_v39 = vadd.f32 %v660_v33, %v316_v34  ;;  %v396_v34 = vmul.f32 %v672_v60, %v672_v60 }
  0x63   : > { %v452_v13 = vadd.f32 %v451_v8, %v389_v3  ;;  %v705_v8 = vunpack.c.h.bf16 %v736_v63 }
  0x64   : > { %v318_v43 = vadd.f32 %v661_v38, %v317_v39  ;;  %v397_v39 = vmul.f32 %v673_v1, %v673_v1 }
  0x65   : > { %v453_v17 = vadd.f32 %v452_v13, %v390_v7  ;;  %v406_v13 = vmul.f32 %v692_v41, %v692_v41 }
  0x66   : > { %v319_v48 = vadd.f32 %v664_v42, %v318_v43  ;;  %v398_v43 = vmul.f32 %v676_v5, %v676_v5 }
  0x67   : > { %v454_v22 = vadd.f32 %v453_v17, %v391_v12 }
  0x68   : > { %v320_v52 = vadd.f32 %v665_v47, %v319_v48  ;;  %v399_v48 = vmul.f32 %v677_v10, %v677_v10 }
  0x69   : > { %v455_v26 = vadd.f32 %v454_v22, %v392_v16  ;;  %v407_v16 = vmul.f32 %v693_v46, %v693_v46  ;;  %v409_v22 = vmul.f32 %v697_v55, %v697_v55 }
  0x6a   : > { %v321_v57 = vadd.f32 %v668_v51, %v320_v52  ;;  %v400_v52 = vmul.f32 %v680_v14, %v680_v14 }
  0x6b   : > { %v456_v31 = vadd.f32 %v455_v26, %v393_v21 }
  0x6c   : > { %v322_v61 = vadd.f32 %v669_v56, %v321_v57  ;;  %v401_v57 = vmul.f32 %v681_v19, %v681_v19 }
  0x6d   : > { %v457_v35 = vadd.f32 %v456_v31, %v394_v25  ;;  %v410_v25 = vmul.f32 %v700_v59, %v700_v59 }
  0x6e   : > { %v323_v2 = vadd.f32 %v672_v60, %v322_v61  ;;  %v402_v61 = vmul.f32 %v684_v23, %v684_v23 }
  0x6f   : > { %v458_v40 = vadd.f32 %v457_v35, %v395_v30  ;;  %v277_v30 = vld [vmem:[#allocation2] sm:$0x1]  ;;  %v413_v35 = vmul.f32 %v705_v8, %v705_v8 }
  0x70   : > { %v324_v6 = vadd.f32 %v673_v1, %v323_v2  ;;  %v403_v2 = vmul.f32 %v685_v28, %v685_v28 }
  0x71   : > { %v459_v44 = vadd.f32 %v458_v40, %v396_v34 }
  0x72   : > { %v325_v11 = vadd.f32 %v676_v5, %v324_v6  ;;  %v404_v6 = vmul.f32 %v688_v32, %v688_v32 }
  0x73   : > { %v460_v49 = vadd.f32 %v459_v44, %v397_v39  ;;  %v349_v44 = vld [vmem:[#allocation3] sm:$0x1] }
  0x74   : > { %v326_v15 = vadd.f32 %v677_v10, %v325_v11  ;;  %v405_v10 = vmul.f32 %v689_v37, %v689_v37 }
  0x75   : > { %v461_v53 = vadd.f32 %v460_v49, %v398_v43 }
  0x76   : > { %v327_v20 = vadd.f32 %v680_v14, %v326_v15 }
  0x77   : > { %v462_v58 = vadd.f32 %v461_v53, %v399_v48 }
  0x78   : > { %v328_v24 = vadd.f32 %v681_v19, %v327_v20  ;;  %v408_v19 = vmul.f32 %v696_v50, %v696_v50 }
  0x79   : > { %v463_v62 = vadd.f32 %v462_v58, %v400_v52 }
  0x7a   : > { %v329_v29 = vadd.f32 %v684_v23, %v328_v24 }
  0x7b   : > { %v464_v3 = vadd.f32 %v463_v62, %v401_v57 }
  0x7c   : > { %v330_v33 = vadd.f32 %v685_v28, %v329_v29  ;;  %v411_v28 = vmul.f32 %v701_v0, %v701_v0 }
  0x7d   : > { %v465_v7 = vadd.f32 %v464_v3, %v402_v61 }
  0x7e   : > { %v331_v38 = vadd.f32 %v688_v32, %v330_v33  ;;  %v412_v32 = vmul.f32 %v704_v4, %v704_v4 }
  0x7f   : > { %v466_v11 = vadd.f32 %v465_v7, %v403_v2 }
  0x80   : > { %v332_v42 = vadd.f32 %v689_v37, %v331_v38 }
  0x81   : > { %v467_v14 = vadd.f32 %v466_v11, %v404_v6 }
  0x82   : > { %v333_v47 = vadd.f32 %v692_v41, %v332_v42 }
  0x83   : > { %v468_v17 = vadd.f32 %v467_v14, %v405_v10 }
  0x84   : > { %v334_v51 = vadd.f32 %v693_v46, %v333_v47 }
  0x85   : > { %v469_v20 = vadd.f32 %v468_v17, %v406_v13 }
  0x86   : > { %v335_v56 = vadd.f32 %v696_v50, %v334_v51 }
  0x87   : > { %v470_v23 = vadd.f32 %v469_v20, %v407_v16 }
  0x88   : > { %v336_v60 = vadd.f32 %v697_v55, %v335_v56 }
  0x89   : > { %v471_v26 = vadd.f32 %v470_v23, %v408_v19 }
  0x8a   : > { %v337_v1 = vadd.f32 %v700_v59, %v336_v60 }
  0x8b   : > { %v472_v29 = vadd.f32 %v471_v26, %v409_v22 }
  0x8c   : > { %v338_v5 = vadd.f32 %v701_v0, %v337_v1 }
  0x8d   : > { %v473_v33 = vadd.f32 %v472_v29, %v410_v25 }
  0x8e   : > { %v339_v9 = vadd.f32 %v704_v4, %v338_v5 }
  0x8f   : > { %v474_v36 = vadd.f32 %v473_v33, %v411_v28 }
  0x90   : > { %v340_v12 = vadd.f32 %v705_v8, %v339_v9 }
  0x91   : > { %v475_v37 = vadd.f32 %v474_v36, %v412_v32 }
  0x92   : > { %v341_v15 = vrot.slane %v340_v12, 4 }
  0x93   : > { %v476_v38 = vadd.f32 %v475_v37, %v413_v35 }
  0x94   : > { %v342_v18 = vadd.f32 %v341_v15, %v340_v12 }
  0x95   : > { %v477_v39 = vrot.slane %v476_v38, 4 }
  0x96   : > { %v343_v21 = vrot.slane %v342_v18, 2 }
  0x97   : > { %v478_v40 = vadd.f32 %v477_v39, %v476_v38 }
  0x98   : > { %v344_v24 = vadd.f32 %v343_v21, %v342_v18 }
  0x99   : > { %v479_v41 = vrot.slane %v478_v40, 2 }
  0x9a   : > { %v345_v27 = vrot.slane %v344_v24, 1 }
  0x9b   : > { %v480_v42 = vadd.f32 %v479_v41, %v478_v40 }
  0x9c   : > { %v346_v31 = vadd.f32 %v345_v27, %v344_v24 }
  0x9d   : > { %v481_v43 = vrot.slane %v480_v42, 1 }
  0x9e   : > { %v347_v34 = vadd.f32 %v346_v31, %v277_v30 }
  0x9f   : > { %v482_v45 = vadd.f32 %v481_v43, %v480_v42 }
  0xa0   : > { %348 = vst [vmem:[#allocation2] sm:$0x1] %v347_v34 }
  0xa1   : > { %v483_v46 = vadd.f32 %v482_v45, %v349_v44 }
  0xa3   : > { %484 = vst [vmem:[#allocation3] sm:$0x1] %v483_v46 }
  0xa7   : > { %v488_v47 = vld [vmem:[#allocation2] sm:$0x1] }
  0xaa   : > { %v574_v48 = vld [vmem:[#allocation3] ss:$0 sm:$0xff] }
  0xab   : > { %v497_v49 = vsel %vm496_vm0, %v488_v47, %v574_v48 }
  0xac   : > { %498 = vst [vmem:[%s142_s17] sm:$0x3] %v497_v49 }
  0xad PF: > { %s11_s8 = sadd.s32 1, %s784_s8   ;;  %s870_s6 = smov %s780_s7 }
  0xae   : > { %p8_p5 = scmp.ge.s32.totalorder %s11_s8, 4   ;;  %s871_s7 = smov %s873_s9 }
  0xb0   :  { %10 = sbr.rel (!%p8_p5) target bundleno = 2 (0x2), region = 62 }

// kernel: _lambda_.5
= control target key start
LH: loop header
LB: loop body
LE: loop exit
PB: predicated region body
PF: predicated region fallthrough
CT: control target
= control target key end

     0   :  { %s1012_s9 = smov 0   ;;  %s1014_s10 = smov 0   ;;  %s1108_s0 = inlined_call_operand.vmem [shape: bf16[2,512,128], index: 0, kind: input, shape index: {}]   ;;  %s1109_s1 = inlined_call_operand.vmem [shape: f32[2,128,2], index: 1, kind: input, shape index: {}]   ;;  %s1110_s2 = inlined_call_operand.vmem [shape: f32[2,32,512], index: 2, kind: output, shape index: {}]  }
   0x1   :  { %s1016_s11 = smov 0  }
   0x2 LB: > { %s24_s12 = sadd.s32 1, %s989_s10  ;;  %p666_p0 = scmp.ge.s32.totalorder %s993_s11, 1  ;;  %s993_s11 = sphi %s1016_s11, %s12_s11   ;;  %s989_s10 = sphi %s1014_s10, %s1112_s10   ;;  %s985_s9 = sphi %s1012_s9, %s1111_s9  }
   0x3   : > { %p26_p1 = scmp.ge.s32.totalorder %s24_s12, 2  ;;  %p143_p2 = scmp.lt.s32.totalorder %s993_s11, 3 }
   0x5   : > { %s1114_s12 = smov (%p26_p1, %s24_s12), 0  ;;  %p144_p3 = pnand %p666_p0, %p143_p2 }
   0x6   : > { %p179_p4 = scmp.lt.s32.totalorder (!%p144_p3), %s985_s9, 1 }
   0x7   : > { %147 = sbr.rel (%p144_p3) target bundleno = 270 (0x10e), region = 28 }
   0xe   : > { %s1116_s9 = smov (!%p179_p4, %s985_s9), 1 }
   0xf   : > { %s675_s13 = sshll.u32 %s1116_s9, 8  ;;  %s676_s17 = sshll.u32 %s1116_s9, 7 }
  0x10   : > { %s1036_s16 = scalar_lea.vmem %s1108_s0, %s675_s13  ;;  %s192_s20 = scalar_lea.vmem %s1109_s1, %s676_s17 }
  0x11   : > { %v821_v0 = vld [vmem:[%s1036_s16 + $0x80] sm:$0xff]   ;;  %v822_v12 = vld [vmem:[%s1036_s16 + $0x88] sm:$0xff]   ;;  %v823_v30 = vld [vmem:[%s1036_s16 + $0x90] sm:$0xff]   ;;  %s1081_s23 = scalar_lea.vmem %s1110_s2, %s676_s17 }
  0x12   : > { %v829_v1 = vld [vmem:[%s1036_s16 + $0xc0] sm:$0xff]   ;;  %v744_v3 = vunpack.c.l.bf16 %v821_v0  ;;  %v745_v7 = vunpack.c.h.bf16 %v821_v0  ;;  %v830_v13 = vld [vmem:[%s1036_s16 + $0xc8] sm:$0xff]   ;;  %v748_v19 = vunpack.c.l.bf16 %v822_v12  ;;  %v749_v25 = vunpack.c.h.bf16 %v822_v12  ;;  %v831_v31 = vld [vmem:[%s1036_s16 + $0xd0] sm:$0xff]  }
  0x13   : > { %v679_v2 = vld [vmem:[%s1036_s16] sm:$0xff]   ;;  %v776_v4 = vunpack.c.l.bf16 %v829_v1  ;;  %v777_v9 = vunpack.c.h.bf16 %v829_v1  ;;  %v806_v15 = vld [vmem:[%s1036_s16 + $0x8] sm:$0xff]   ;;  %v780_v20 = vunpack.c.l.bf16 %v830_v13  ;;  %v781_v26 = vunpack.c.h.bf16 %v830_v13  ;;  %v807_v32 = vld [vmem:[%s1036_s16 + $0x10] sm:$0xff]  }
  0x14   : > { %v680_v5 = vunpack.c.l.bf16 %v679_v2  ;;  %v813_v6 = vld [vmem:[%s1036_s16 + $0x40] sm:$0xff]   ;;  %v681_v10 = vunpack.c.h.bf16 %v679_v2  ;;  %v814_v16 = vld [vmem:[%s1036_s16 + $0x48] sm:$0xff]   ;;  %v684_v22 = vunpack.c.l.bf16 %v806_v15  ;;  %v685_v28 = vunpack.c.h.bf16 %v806_v15  ;;  %v815_v33 = vld [vmem:[%s1036_s16 + $0x50] sm:$0xff]  }
  0x15   : > { %v712_v8 = vunpack.c.l.bf16 %v813_v6  ;;  %v713_v11 = vunpack.c.h.bf16 %v813_v6  ;;  %v916_v14 = vpack.i.bf16 %v776_v4, %v744_v3  ;;  %v918_v18 = vpack.i.bf16 %v777_v9, %v745_v7  ;;  %v824_v46 = vld [vmem:[%s1036_s16 + $0x98] sm:$0xff]   ;;  %v825_v62 = vld [vmem:[%s1036_s16 + $0xa0] sm:$0xff]   ;;  %v834_v15 = vld [vmem:[%s1036_s16 + $0xe8] sm:$0xff]  }
  0x16   : > { %v716_v23 = vunpack.c.l.bf16 %v814_v16  ;;  %v920_v24 = vpack.i.bf16 %v780_v20, %v748_v19  ;;  %v717_v29 = vunpack.c.h.bf16 %v814_v16  ;;  %v922_v34 = vpack.i.bf16 %v781_v26, %v749_v25  ;;  %v832_v47 = vld [vmem:[%s1036_s16 + $0xd8] sm:$0xff]   ;;  %v833_v63 = vld [vmem:[%s1036_s16 + $0xe0] sm:$0xff]   ;;  %v810_v16 = vld [vmem:[%s1036_s16 + $0x28] sm:$0xff]  }
  0x17   : > { %v863_v17 = vpack.i.bf16 %v712_v8, %v680_v5  ;;  %917 = vxpose.xlu1.b32.start [1/16] (narrow) %v916_v14, 32  ;;  %v865_v21 = vpack.i.bf16 %v713_v11, %v681_v10  ;;  %v752_v35 = vunpack.c.l.bf16 %v823_v30  ;;  %v784_v36 = vunpack.c.l.bf16 %v831_v31  ;;  %v808_v48 = vld [vmem:[%s1036_s16 + $0x18] sm:$0xff]   ;;  %v809_v0 = vld [vmem:[%s1036_s16 + $0x20] sm:$0xff]   ;;  %v826_v14 = vld [vmem:[%s1036_s16 + $0xa8] sm:$0xff]  }
  0x18   : > { %v867_v27 = vpack.i.bf16 %v716_v23, %v684_v22  ;;  %v869_v37 = vpack.i.bf16 %v717_v29, %v685_v28  ;;  %v688_v38 = vunpack.c.l.bf16 %v807_v32  ;;  %v720_v39 = vunpack.c.l.bf16 %v815_v33  ;;  %v816_v49 = vld [vmem:[%s1036_s16 + $0x58] sm:$0xff]   ;;  %v817_v1 = vld [vmem:[%s1036_s16 + $0x60] sm:$0xff]  }
  0x19   : > { %864 = vxpose.xlu0.b32.start [1/16] (narrow) %v863_v17, 32  ;;  %v924_v40 = vpack.i.bf16 %v784_v36, %v752_v35  ;;  %v753_v41 = vunpack.c.h.bf16 %v823_v30  ;;  %v785_v42 = vunpack.c.h.bf16 %v831_v31  ;;  %v689_v44 = vunpack.c.h.bf16 %v807_v32  ;;  %v818_v17 = vld [vmem:[%s1036_s16 + $0x68] sm:$0xff]   ;;  %v827_v30 = vld [vmem:[%s1036_s16 + $0xb0] sm:$0xff]  }
  0x1a   : > { %v871_v43 = vpack.i.bf16 %v720_v39, %v688_v38  ;;  %v721_v45 = vunpack.c.h.bf16 %v815_v33  ;;  %v756_v51 = vunpack.c.l.bf16 %v824_v46  ;;  %v788_v52 = vunpack.c.l.bf16 %v832_v47  ;;  %v835_v31 = vld [vmem:[%s1036_s16 + $0xf0] sm:$0xff]  }
  0x1b   : > { %919 = vxpose.xlu1.b32.cont [2/16] (narrow) %v918_v18, 32  ;;  %v926_v50 = vpack.i.bf16 %v785_v42, %v753_v41  ;;  %v692_v54 = vunpack.c.l.bf16 %v808_v48  ;;  %v724_v55 = vunpack.c.l.bf16 %v816_v49  ;;  %v757_v57 = vunpack.c.h.bf16 %v824_v46  ;;  %v811_v32 = vld [vmem:[%s1036_s16 + $0x30] sm:$0xff]   ;;  %v828_v46 = vld [vmem:[%s1036_s16 + $0xb8] sm:$0xff]  }
  0x1c   : > { %v873_v53 = vpack.i.bf16 %v721_v45, %v689_v44  ;;  %v928_v56 = vpack.i.bf16 %v788_v52, %v756_v51  ;;  %v789_v58 = vunpack.c.h.bf16 %v832_v47  ;;  %v693_v60 = vunpack.c.h.bf16 %v808_v48  ;;  %v819_v33 = vld [vmem:[%s1036_s16 + $0x70] sm:$0xff]   ;;  %v836_v47 = vld [vmem:[%s1036_s16 + $0xf8] sm:$0xff]  }
  0x1d   : > { %866 = vxpose.xlu0.b32.cont [2/16] (narrow) %v865_v21, 32  ;;  %v875_v59 = vpack.i.bf16 %v724_v55, %v692_v54  ;;  %v725_v61 = vunpack.c.h.bf16 %v816_v49  ;;  %v760_v3 = vunpack.c.l.bf16 %v825_v62  ;;  %v792_v4 = vunpack.c.l.bf16 %v833_v63  ;;  %v812_v48 = vld [vmem:[%s1036_s16 + $0x38] sm:$0xff]  }
  0x1e   : > { %v930_v2 = vpack.i.bf16 %v789_v58, %v757_v57  ;;  %v696_v6 = vunpack.c.l.bf16 %v809_v0  ;;  %v728_v7 = vunpack.c.l.bf16 %v817_v1  ;;  %v761_v9 = vunpack.c.h.bf16 %v825_v62  ;;  %v820_v49 = vld [vmem:[%s1036_s16 + $0x78] sm:$0xff]  }
  0x1f   : > { %921 = vxpose.xlu1.b32.cont [3/16] (narrow) %v920_v24, 32  ;;  %v877_v5 = vpack.i.bf16 %v725_v61, %v693_v60  ;;  %v932_v8 = vpack.i.bf16 %v792_v4, %v760_v3  ;;  %v793_v10 = vunpack.c.h.bf16 %v833_v63  ;;  %v697_v12 = vunpack.c.h.bf16 %v809_v0  ;;  %v460_v0 = vld [vmem:[%s192_s20 + $0x8] sm:$0xff]  ;;  %v462_v3 = vld [vmem:[%s192_s20 + $0x18] sm:$0xff]  ;;  %v459_v4 = vld [vmem:[%s192_s20] sm:$0xff] }
  0x20   : > { %v879_v11 = vpack.i.bf16 %v728_v7, %v696_v6  ;;  %v729_v13 = vunpack.c.h.bf16 %v817_v1  ;;  %v764_v19 = vunpack.c.l.bf16 %v826_v14  ;;  %v796_v20 = vunpack.c.l.bf16 %v834_v15 }
  0x21   : > { %868 = vxpose.xlu0.b32.cont [3/16] (narrow) %v867_v27, 32  ;;  %v934_v18 = vpack.i.bf16 %v793_v10, %v761_v9  ;;  %v700_v22 = vunpack.c.l.bf16 %v810_v16  ;;  %v732_v23 = vunpack.c.l.bf16 %v818_v17  ;;  %v765_v25 = vunpack.c.h.bf16 %v826_v14 }
  0x22   : > { %v881_v21 = vpack.i.bf16 %v729_v13, %v697_v12  ;;  %v936_v24 = vpack.i.bf16 %v796_v20, %v764_v19  ;;  %v797_v26 = vunpack.c.h.bf16 %v834_v15  ;;  %v701_v28 = vunpack.c.h.bf16 %v810_v16 }
  0x23   : > { %923 = vxpose.xlu1.b32.cont [4/16] (narrow) %v922_v34, 32  ;;  %v883_v27 = vpack.i.bf16 %v732_v23, %v700_v22  ;;  %v733_v29 = vunpack.c.h.bf16 %v818_v17  ;;  %v768_v35 = vunpack.c.l.bf16 %v827_v30  ;;  %v800_v36 = vunpack.c.l.bf16 %v835_v31 }
  0x24   : > { %v938_v34 = vpack.i.bf16 %v797_v26, %v765_v25  ;;  %v704_v38 = vunpack.c.l.bf16 %v811_v32  ;;  %v736_v39 = vunpack.c.l.bf16 %v819_v33  ;;  %v769_v41 = vunpack.c.h.bf16 %v827_v30 }
  0x25   : > { %870 = vxpose.xlu0.b32.cont [4/16] (narrow) %v869_v37, 32  ;;  %v885_v37 = vpack.i.bf16 %v733_v29, %v701_v28  ;;  %v801_v42 = vunpack.c.h.bf16 %v835_v31  ;;  %v705_v44 = vunpack.c.h.bf16 %v811_v32  ;;  %v737_v45 = vunpack.c.h.bf16 %v819_v33 }
  0x26   : > { %v772_v51 = vunpack.c.l.bf16 %v828_v46  ;;  %v804_v52 = vunpack.c.l.bf16 %v836_v47  ;;  %v708_v54 = vunpack.c.l.bf16 %v812_v48  ;;  %v740_v55 = vunpack.c.l.bf16 %v820_v49 }
  0x27   : > { %925 = vxpose.xlu1.b32.cont [5/16] (narrow) %v924_v40, 32  ;;  %v940_v40 = vpack.i.bf16 %v800_v36, %v768_v35  ;;  %v773_v57 = vunpack.c.h.bf16 %v828_v46  ;;  %v805_v58 = vunpack.c.h.bf16 %v836_v47  ;;  %v709_v60 = vunpack.c.h.bf16 %v812_v48 }
  0x28   : > { %v741_v61 = vunpack.c.h.bf16 %v820_v49  ;;  %v995_v1 = vmov 0  }
  0x29   : > { %872 = vxpose.xlu0.b32.cont [5/16] (narrow) %v871_v43, 32  ;;  %v887_v43 = vpack.i.bf16 %v736_v39, %v704_v38  ;;  %v946_v62 = vpack.i.bf16 %v805_v58, %v773_v57 }
  0x2a   : > { %v893_v63 = vpack.i.bf16 %v741_v61, %v709_v60 }
  0x2b   : > { %927 = vxpose.xlu1.b32.cont [6/16] (narrow) %v926_v50, 32  ;;  %v942_v50 = vpack.i.bf16 %v801_v42, %v769_v41 }
  0x2d   : > { %874 = vxpose.xlu0.b32.cont [6/16] (narrow) %v873_v53, 32  ;;  %v889_v53 = vpack.i.bf16 %v737_v45, %v705_v44 }
  0x2f   : > { %929 = vxpose.xlu1.b32.cont [7/16] (narrow) %v928_v56, 32  ;;  %v944_v56 = vpack.i.bf16 %v804_v52, %v772_v51 }
  0x31   : > { %876 = vxpose.xlu0.b32.cont [7/16] (narrow) %v875_v59, 32  ;;  %v891_v59 = vpack.i.bf16 %v740_v55, %v708_v54 }
  0x33   : > { %931 = vxpose.xlu1.b32.cont [8/16] (narrow) %v930_v2, 32  ;;  %v461_v2 = vld [vmem:[%s192_s20 + $0x10] sm:$0xff] }
  0x35   : > { %878 = vxpose.xlu0.b32.cont [8/16] (narrow) %v877_v5, 32  ;;  %v996_v5 = vmov 1  }
  0x37   : > { %933 = vxpose.xlu1.b32.cont [9/16] (narrow) %v932_v8, 32 }
  0x39   : > { %880 = vxpose.xlu0.b32.cont [9/16] (narrow) %v879_v11, 32 }
  0x3b   : > { %935 = vxpose.xlu1.b32.cont [10/16] (narrow) %v934_v18, 32 }
  0x3d   : > { %882 = vxpose.xlu0.b32.cont [10/16] (narrow) %v881_v21, 32 }
  0x3f   : > { %937 = vxpose.xlu1.b32.cont [11/16] (narrow) %v936_v24, 32 }
  0x41   : > { %884 = vxpose.xlu0.b32.cont [11/16] (narrow) %v883_v27, 32 }
  0x43   : > { %939 = vxpose.xlu1.b32.cont [12/16] (narrow) %v938_v34, 32 }
  0x45   : > { %886 = vxpose.xlu0.b32.cont [12/16] (narrow) %v885_v37, 32 }
  0x47   : > { %941 = vxpose.xlu1.b32.cont [13/16] (narrow) %v940_v40, 32 }
  0x49   : > { %888 = vxpose.xlu0.b32.cont [13/16] (narrow) %v887_v43, 32 }
  0x4b   : > { %943 = vxpose.xlu1.b32.cont [14/16] (narrow) %v942_v50, 32 }
  0x4d   : > { %890 = vxpose.xlu0.b32.cont [14/16] (narrow) %v889_v53, 32 }
  0x4f   : > { %945 = vxpose.xlu1.b32.cont [15/16] (narrow) %v944_v56, 32 }
  0x51   : > { %892 = vxpose.xlu0.b32.cont [15/16] (narrow) %v891_v59, 32 }
  0x53   : > { %947 = vxpose.xlu1.b32.end [16/16] (narrow) %v946_v62, 32 }
  0x55   : > { %894 = vxpose.xlu0.b32.end [16/16] (narrow) %v893_v63, 32 }
  0x71   : > { %968 = vset.pattern.permute.xlu1 %v995_v1 }
  0x72   : > { %470 = vperm.xlu1 %968, %v460_v0  }
  0x76   : > { %475 = vperm.xlu1 %968, %v461_v2  }
  0x7a   : > { %480 = vperm.xlu1 %968, %v462_v3  }
  0x7e   : > { %915 = vset.pattern.permute.xlu0 %v995_v1  ;;  %969 = vset.pattern.permute.xlu1 %v996_v5 }
  0x7f   : > { %465 = vperm.xlu0 %915, %v459_v4   ;;  %500 = vperm.xlu1 %969, %v459_v4  }
  0x83   : > { %970 = vset.pattern.permute.xlu0 %v996_v5  ;;  %508 = vperm.xlu1 %969, %v461_v2  }
  0x84   : > { %504 = vperm.xlu0 %970, %v460_v0  }
  0x87   : > { %512 = vperm.xlu1 %969, %v462_v3  }
  0x97   : > { %v948_v6 = vpop.trf.xlu1 }
  0x98   : > { %v952_v16 = vunpack.i.h.bf16 %v948_v6  ;;  %v949_v17 = vunpack.i.l.bf16 %v948_v6 }
  0x99   : > { %v895_v7 = vpop.trf.xlu0 }
  0x9a   : > { %v899_v23 = vunpack.i.h.bf16 %v895_v7  ;;  %v896_v24 = vunpack.i.l.bf16 %v895_v7 }
  0x9b   : > { %v953_v8 = vpop.trf.xlu1 }
  0x9c   : > { %v957_v21 = vunpack.i.h.bf16 %v953_v8  ;;  %v954_v22 = vunpack.i.l.bf16 %v953_v8 }
  0x9d   : > { %v900_v9 = vpop.trf.xlu0 }
  0x9e   : > { %v904_v18 = vunpack.i.h.bf16 %v900_v9  ;;  %v901_v19 = vunpack.i.l.bf16 %v900_v9 }
  0x9f   : > { %v958_v10 = vpop.trf.xlu1 }
  0xa0   : > { %v962_v25 = vunpack.i.h.bf16 %v958_v10  ;;  %v959_v26 = vunpack.i.l.bf16 %v958_v10 }
  0xa1   : > { %v905_v11 = vpop.trf.xlu0 }
  0xa2   : > { %v909_v27 = vunpack.i.h.bf16 %v905_v11  ;;  %v906_v28 = vunpack.i.l.bf16 %v905_v11 }
  0xa3   : > { %v963_v12 = vpop.trf.xlu1 }
  0xa4   : > { %v967_v29 = vunpack.i.h.bf16 %v963_v12  ;;  %v964_v30 = vunpack.i.l.bf16 %v963_v12 }
  0xa5   : > { %v910_v13 = vpop.trf.xlu0 }
  0xa6   : > { %v914_v31 = vunpack.i.h.bf16 %v910_v13  ;;  %v911_v32 = vunpack.i.l.bf16 %v910_v13 }
  0xf1   : > { %v471_v14 = vpop.permute.xlu1 %470 }
  0xf2   : > { %v489_v34 = vmul.f32 %v954_v22, %v471_v14  ;;  %v490_v35 = vmul.f32 %v957_v21, %v471_v14  ;;  %v487_v36 = vmul.f32 %v901_v19, %v471_v14  ;;  %v488_v37 = vmul.f32 %v904_v18, %v471_v14 }
  0xf5   : > { %v476_v15 = vpop.permute.xlu1 %475 }
  0xf6   : > { %v491_v43 = vmul.f32 %v906_v28, %v476_v15  ;;  %v492_v44 = vmul.f32 %v909_v27, %v476_v15  ;;  %v493_v45 = vmul.f32 %v959_v26, %v476_v15  ;;  %v494_v46 = vmul.f32 %v962_v25, %v476_v15 }
  0xf9   : > { %v481_v20 = vpop.permute.xlu1 %480 }
  0xfa   : > { %v495_v51 = vmul.f32 %v911_v32, %v481_v20  ;;  %v496_v52 = vmul.f32 %v914_v31, %v481_v20  ;;  %v497_v53 = vmul.f32 %v964_v30, %v481_v20  ;;  %v498_v54 = vmul.f32 %v967_v29, %v481_v20 }
  0xfe   : > { %v466_v33 = vpop.permute.xlu0 %465  ;;  %v501_v42 = vpop.permute.xlu1 %500 }
  0xff   : > { %v483_v38 = vmul.f32 %v896_v24, %v466_v33  ;;  %v484_v39 = vmul.f32 %v899_v23, %v466_v33  ;;  %v485_v40 = vmul.f32 %v949_v17, %v466_v33  ;;  %v486_v41 = vmul.f32 %v952_v16, %v466_v33 }
 0x101   : > { %v515_v47 = vadd.f32 %v501_v42, %v483_v38  ;;  %v516_v48 = vadd.f32 %v501_v42, %v484_v39  ;;  %v517_v49 = vadd.f32 %v501_v42, %v485_v40  ;;  %v518_v50 = vadd.f32 %v501_v42, %v486_v41 }
 0x102   : > { %v509_v60 = vpop.permute.xlu1 %508 }
 0x103   : > { %v531_v55 = vmax.f32 %v515_v47, 0.0  ;;  %v532_v56 = vmax.f32 %v516_v48, 0.0  ;;  %v533_v57 = vmax.f32 %v517_v49, 0.0  ;;  %v534_v58 = vmax.f32 %v518_v50, 0.0  ;;  %v505_v59 = vpop.permute.xlu0 %504 }
 0x104   : > { %v519_v61 = vadd.f32 %v505_v59, %v487_v36  ;;  %v520_v62 = vadd.f32 %v505_v59, %v488_v37  ;;  %v521_v63 = vadd.f32 %v505_v59, %v489_v34  ;;  %v522_v0 = vadd.f32 %v505_v59, %v490_v35 }
 0x105   : > { %547 = vst [vmem:[%s1081_s23] sm:$0xff] %v531_v55  ;;  %548 = vst [vmem:[%s1081_s23 + $0x8] sm:$0xff] %v532_v56  ;;  %v523_v1 = vadd.f32 %v509_v60, %v491_v43  ;;  %v524_v2 = vadd.f32 %v509_v60, %v492_v44  ;;  %v525_v3 = vadd.f32 %v509_v60, %v493_v45 }
 0x106   : > { %549 = vst [vmem:[%s1081_s23 + $0x10] sm:$0xff] %v533_v57  ;;  %550 = vst [vmem:[%s1081_s23 + $0x18] sm:$0xff] %v534_v58  ;;  %v526_v4 = vadd.f32 %v509_v60, %v494_v46  ;;  %v535_v5 = vmax.f32 %v519_v61, 0.0  ;;  %v536_v6 = vmax.f32 %v520_v62, 0.0  ;;  %v537_v7 = vmax.f32 %v521_v63, 0.0  ;;  %v513_v13 = vpop.permute.xlu1 %512 }
 0x107   : > { %v538_v8 = vmax.f32 %v522_v0, 0.0  ;;  %v539_v9 = vmax.f32 %v523_v1, 0.0  ;;  %v540_v10 = vmax.f32 %v524_v2, 0.0  ;;  %v541_v11 = vmax.f32 %v525_v3, 0.0 }
 0x108   : > { %v542_v12 = vmax.f32 %v526_v4, 0.0  ;;  %551 = vst [vmem:[%s1081_s23 + $0x20] sm:$0xff] %v535_v5  ;;  %552 = vst [vmem:[%s1081_s23 + $0x28] sm:$0xff] %v536_v6  ;;  %v527_v14 = vadd.f32 %v513_v13, %v495_v51  ;;  %v528_v15 = vadd.f32 %v513_v13, %v496_v52  ;;  %v529_v16 = vadd.f32 %v513_v13, %v497_v53 }
 0x109   : > { %553 = vst [vmem:[%s1081_s23 + $0x30] sm:$0xff] %v537_v7  ;;  %554 = vst [vmem:[%s1081_s23 + $0x38] sm:$0xff] %v538_v8  ;;  %v530_v17 = vadd.f32 %v513_v13, %v498_v54 }
 0x10a   : > { %555 = vst [vmem:[%s1081_s23 + $0x40] sm:$0xff] %v539_v9  ;;  %556 = vst [vmem:[%s1081_s23 + $0x48] sm:$0xff] %v540_v10  ;;  %v543_v18 = vmax.f32 %v527_v14, 0.0  ;;  %v544_v19 = vmax.f32 %v528_v15, 0.0  ;;  %v545_v20 = vmax.f32 %v529_v16, 0.0 }
 0x10b   : > { %557 = vst [vmem:[%s1081_s23 + $0x50] sm:$0xff] %v541_v11  ;;  %558 = vst [vmem:[%s1081_s23 + $0x58] sm:$0xff] %v542_v12  ;;  %v546_v21 = vmax.f32 %v530_v17, 0.0 }
 0x10c   : > { %559 = vst [vmem:[%s1081_s23 + $0x60] sm:$0xff] %v543_v18  ;;  %560 = vst [vmem:[%s1081_s23 + $0x68] sm:$0xff] %v544_v19 }
 0x10d   : > { %561 = vst [vmem:[%s1081_s23 + $0x70] sm:$0xff] %v545_v20  ;;  %562 = vst [vmem:[%s1081_s23 + $0x78] sm:$0xff] %v546_v21 }
 0x10e PF: > { %s12_s11 = sadd.s32 1, %s993_s11   ;;  %s1111_s9 = smov %s989_s10 }
 0x10f   : > { %p9_p5 = scmp.ge.s32.totalorder %s12_s11, 4   ;;  %s1112_s10 = smov %s1114_s12 }
 0x111   :  { %11 = sbr.rel (!%p9_p5) target bundleno = 2 (0x2), region = 61 }

// kernel: _lambda_.3
= control target key start
LH: loop header
LB: loop body
LE: loop exit
PB: predicated region body
PF: predicated region fallthrough
CT: control target
= control target key end

     0   :  { %vm775_vm0 = vcmask 883712   ;;  %vm968_vm1 = vcmask 1045504   ;;  %s4106_s1 = inlined_call_operand.vmem [shape: bf16[108,128], index: 1, kind: input, shape index: {}]   ;;  %s4107_s0 = inlined_call_operand.vmem [shape: bf16[1024,108], index: 0, kind: input, shape index: {}]   ;;  %s4108_s2 = inlined_call_operand.vmem [shape: bf16[1024,128], index: 2, kind: output, shape index: {}]  }
   0x1   :  { %v3551_v0 = vld [vmem:[%s4106_s1] sm:$0xff]   ;;  %v3552_v1 = vld [vmem:[%s4106_s1 + $0x8] sm:$0xff]   ;;  %v3553_v2 = vld [vmem:[%s4106_s1 + $0x10] sm:$0xff]  }
   0x2   :  { %3393 = vmatprep.subr.bf16.mxu0 %v3551_v0  ;;  %3535 = vmatprep.subr.bf16.mxu1 %v3551_v0  ;;  %v3554_v3 = vld [vmem:[%s4106_s1 + $0x18] sm:$0xff]   ;;  %v3558_v4 = vld [vmem:[%s4107_s0] sm:$0xff]   ;;  %v3556_v7 = vld [vmem:[%s4106_s1 + $0x28] sm:$0xff]  }
   0x3   :  { %3394 = vmatpush3.bf16.msra.mxu0 %v3551_v0  ;;  %3542 = vmatpush3.bf16.msra.mxu1 %v3551_v0  ;;  %v3559_v5 = vld [vmem:[%s4107_s0 + $0x100] sm:$0xff]   ;;  %v3557_v8 = vld [vmem:[%s4106_s1 + $0x30] sm:$0x3f]   ;;  %v3560_v10 = vld [vmem:[%s4107_s0 + $0x8] sm:$0xff]  }
   0x4   :  { %3395 = vmatprep.subr.bf16.mxu0 %v3552_v1  ;;  %3536 = vmatprep.subr.bf16.mxu1 %v3552_v1  ;;  %v3555_v6 = vld [vmem:[%s4106_s1 + $0x20] sm:$0xff]   ;;  %v970_v9 = vsel %vm968_vm1, %v3557_v8, 0  ;;  %v3561_v11 = vld [vmem:[%s4107_s0 + $0x108] sm:$0xff]   ;;  %v3562_v12 = vld [vmem:[%s4107_s0 + $0x10] sm:$0xff]  }
   0x5   :  { %3407 = vmatprep.mubr.msk.bf16.mxu0 %vm775_vm0, %v3558_v4  ;;  %3471 = vmatprep.mubr.msk.bf16.mxu1 %vm775_vm0, %v3559_v5  ;;  %v3563_v13 = vld [vmem:[%s4107_s0 + $0x110] sm:$0xff]   ;;  %v3564_v14 = vld [vmem:[%s4107_s0 + $0x18] sm:$0xff]   ;;  %v3566_v16 = vld [vmem:[%s4107_s0 + $0x20] sm:$0xff]  }
   0x6   :  { %v3565_v15 = vld [vmem:[%s4107_s0 + $0x118] sm:$0xff]   ;;  %v3567_v17 = vld [vmem:[%s4107_s0 + $0x120] sm:$0xff]   ;;  %v3568_v18 = vld [vmem:[%s4107_s0 + $0x28] sm:$0xff]  }
   0x7   :  { %3396 = vmatpush3.bf16.msra.mxu0 %v3552_v1  ;;  %3543 = vmatpush3.bf16.msra.mxu1 %v3552_v1  ;;  %v3569_v19 = vld [vmem:[%s4107_s0 + $0x128] sm:$0xff]   ;;  %v3570_v20 = vld [vmem:[%s4107_s0 + $0x30] sm:$0xff]   ;;  %v3572_v22 = vld [vmem:[%s4107_s0 + $0x38] sm:$0xff]  }
   0x8   :  { %3397 = vmatprep.subr.bf16.mxu0 %v3553_v2  ;;  %3537 = vmatprep.subr.bf16.mxu1 %v3553_v2  ;;  %v3571_v21 = vld [vmem:[%s4107_s0 + $0x130] sm:$0xff]   ;;  %v3573_v23 = vld [vmem:[%s4107_s0 + $0x138] sm:$0xff]   ;;  %v3574_v24 = vld [vmem:[%s4107_s0 + $0x40] sm:$0xff]  }
   0x9   :  { %v3575_v25 = vld [vmem:[%s4107_s0 + $0x140] sm:$0xff]   ;;  %v3576_v26 = vld [vmem:[%s4107_s0 + $0x48] sm:$0xff]   ;;  %v3578_v28 = vld [vmem:[%s4107_s0 + $0x50] sm:$0xff]  }
   0xa   :  { %v3577_v27 = vld [vmem:[%s4107_s0 + $0x148] sm:$0xff]   ;;  %v3579_v29 = vld [vmem:[%s4107_s0 + $0x150] sm:$0xff]   ;;  %v3580_v30 = vld [vmem:[%s4107_s0 + $0x58] sm:$0xff]  }
   0xb   :  { %3398 = vmatpush3.bf16.msra.mxu0 %v3553_v2  ;;  %3544 = vmatpush3.bf16.msra.mxu1 %v3553_v2  ;;  %v3581_v31 = vld [vmem:[%s4107_s0 + $0x158] sm:$0xff]   ;;  %v3582_v32 = vld [vmem:[%s4107_s0 + $0x60] sm:$0xff]   ;;  %v3584_v34 = vld [vmem:[%s4107_s0 + $0x68] sm:$0xff]  }
   0xc   :  { %3399 = vmatprep.subr.bf16.mxu0 %v3554_v3  ;;  %3538 = vmatprep.subr.bf16.mxu1 %v3554_v3  ;;  %v3583_v33 = vld [vmem:[%s4107_s0 + $0x160] sm:$0xff]   ;;  %v3585_v35 = vld [vmem:[%s4107_s0 + $0x168] sm:$0xff]   ;;  %v3586_v36 = vld [vmem:[%s4107_s0 + $0x70] sm:$0xff]  }
   0xd   :  { %v3587_v37 = vld [vmem:[%s4107_s0 + $0x170] sm:$0xff]   ;;  %v3588_v38 = vld [vmem:[%s4107_s0 + $0x78] sm:$0xff]   ;;  %v3590_v40 = vld [vmem:[%s4107_s0 + $0x80] sm:$0xff]  }
   0xe   :  { %v3589_v39 = vld [vmem:[%s4107_s0 + $0x178] sm:$0xff]   ;;  %v3591_v41 = vld [vmem:[%s4107_s0 + $0x180] sm:$0xff]   ;;  %v3592_v42 = vld [vmem:[%s4107_s0 + $0x88] sm:$0xff]  }
   0xf   :  { %3400 = vmatpush3.bf16.msra.mxu0 %v3554_v3  ;;  %3545 = vmatpush3.bf16.msra.mxu1 %v3554_v3  ;;  %v3593_v43 = vld [vmem:[%s4107_s0 + $0x188] sm:$0xff]   ;;  %v3594_v44 = vld [vmem:[%s4107_s0 + $0x90] sm:$0xff]   ;;  %v3596_v46 = vld [vmem:[%s4107_s0 + $0x98] sm:$0xff]  }
  0x10   :  { %3401 = vmatprep.subr.bf16.mxu0 %v3555_v6  ;;  %3539 = vmatprep.subr.bf16.mxu1 %v3555_v6  ;;  %v3595_v45 = vld [vmem:[%s4107_s0 + $0x190] sm:$0xff]   ;;  %v3597_v47 = vld [vmem:[%s4107_s0 + $0x198] sm:$0xff]   ;;  %v3598_v48 = vld [vmem:[%s4107_s0 + $0xa0] sm:$0xff]  }
  0x11   :  { %v3599_v49 = vld [vmem:[%s4107_s0 + $0x1a0] sm:$0xff]   ;;  %v3600_v50 = vld [vmem:[%s4107_s0 + $0xa8] sm:$0xff]   ;;  %v3602_v52 = vld [vmem:[%s4107_s0 + $0xb0] sm:$0xff]  }
  0x12   :  { %v3601_v51 = vld [vmem:[%s4107_s0 + $0x1a8] sm:$0xff]   ;;  %v3603_v53 = vld [vmem:[%s4107_s0 + $0x1b0] sm:$0xff]   ;;  %v3604_v54 = vld [vmem:[%s4107_s0 + $0xb8] sm:$0xff]  }
  0x13   :  { %3402 = vmatpush3.bf16.msra.mxu0 %v3555_v6  ;;  %3546 = vmatpush3.bf16.msra.mxu1 %v3555_v6  ;;  %v3605_v55 = vld [vmem:[%s4107_s0 + $0x1b8] sm:$0xff]   ;;  %v3606_v56 = vld [vmem:[%s4107_s0 + $0xc0] sm:$0xff]   ;;  %v3608_v58 = vld [vmem:[%s4107_s0 + $0xc8] sm:$0xff]  }
  0x14   :  { %3403 = vmatprep.subr.bf16.mxu0 %v3556_v7  ;;  %3540 = vmatprep.subr.bf16.mxu1 %v3556_v7  ;;  %v3607_v57 = vld [vmem:[%s4107_s0 + $0x1c0] sm:$0xff]   ;;  %v3609_v59 = vld [vmem:[%s4107_s0 + $0x1c8] sm:$0xff]   ;;  %v3610_v60 = vld [vmem:[%s4107_s0 + $0xd0] sm:$0xff]  }
  0x15   :  { %v3611_v61 = vld [vmem:[%s4107_s0 + $0x1d0] sm:$0xff]   ;;  %v3612_v62 = vld [vmem:[%s4107_s0 + $0xd8] sm:$0xff]   ;;  %v3614_v0 = vld [vmem:[%s4107_s0 + $0xe0] sm:$0xff]  }
  0x16   :  { %v3613_v63 = vld [vmem:[%s4107_s0 + $0x1d8] sm:$0xff]   ;;  %v3615_v1 = vld [vmem:[%s4107_s0 + $0x1e0] sm:$0xff]   ;;  %v3616_v2 = vld [vmem:[%s4107_s0 + $0xe8] sm:$0xff]  }
  0x17   :  { %3404 = vmatpush3.bf16.msra.mxu0 %v3556_v7  ;;  %3547 = vmatpush3.bf16.msra.mxu1 %v3556_v7  ;;  %v3617_v3 = vld [vmem:[%s4107_s0 + $0x1e8] sm:$0xff]   ;;  %v3618_v4 = vld [vmem:[%s4107_s0 + $0xf0] sm:$0xff]   ;;  %v3620_v6 = vld [vmem:[%s4107_s0 + $0xf8] sm:$0xff]  }
  0x18   :  { %3549 = vmatprep.subr.msk.bf16.mxu0 %vm968_vm1, %v3557_v8  ;;  %3550 = vmatprep.subr.msk.bf16.mxu1 %vm968_vm1, %v3557_v8  ;;  %v3619_v5 = vld [vmem:[%s4107_s0 + $0x1f0] sm:$0xff]   ;;  %v3621_v7 = vld [vmem:[%s4107_s0 + $0x1f8] sm:$0xff]  }
  0x1b   :  { %3406 = vmatpush3.bf16.msra.mxu0 %v970_v9  ;;  %3548 = vmatpush3.bf16.msra.mxu1 %v970_v9 }
  0x1e   :  { %3408 = vmatmul.mubr.msk.bf16.vlgmr.msra.gmra.mrb[0].mxu0 %vm775_vm0, %v3560_v10  ;;  %3472 = vmatmul.mubr.msk.bf16.vlgmr.msra.gmra.mrb[0].mxu1 %vm775_vm0, %v3561_v11 }
  0x1f   :  { %3411 = vmatprep.mubr.msk.bf16.mxu0 %vm775_vm0, %v3562_v12  ;;  %3475 = vmatprep.mubr.msk.bf16.mxu1 %vm775_vm0, %v3563_v13 }
  0x26   :  { %3412 = vmatmul.mubr.msk.bf16.gmra.mrb[4].mxu0 %vm775_vm0, %v3564_v14  ;;  %3476 = vmatmul.mubr.msk.bf16.gmra.mrb[4].mxu1 %vm775_vm0, %v3565_v15 }
  0x27   :  { %3415 = vmatprep.mubr.msk.bf16.mxu0 %vm775_vm0, %v3566_v16  ;;  %3479 = vmatprep.mubr.msk.bf16.mxu1 %vm775_vm0, %v3567_v17 }
  0x2e   :  { %3416 = vmatmul.mubr.msk.bf16.gmra.mrb[8].mxu0 %vm775_vm0, %v3568_v18  ;;  %3480 = vmatmul.mubr.msk.bf16.gmra.mrb[8].mxu1 %vm775_vm0, %v3569_v19 }
  0x2f   :  { %3419 = vmatprep.mubr.msk.bf16.mxu0 %vm775_vm0, %v3570_v20  ;;  %3483 = vmatprep.mubr.msk.bf16.mxu1 %vm775_vm0, %v3571_v21 }
  0x36   :  { %3420 = vmatmul.mubr.msk.bf16.gmra.mrb[12].mxu0 %vm775_vm0, %v3572_v22  ;;  %3484 = vmatmul.mubr.msk.bf16.gmra.mrb[12].mxu1 %vm775_vm0, %v3573_v23 }
  0x37   :  { %3423 = vmatprep.mubr.msk.bf16.mxu0 %vm775_vm0, %v3574_v24  ;;  %3487 = vmatprep.mubr.msk.bf16.mxu1 %vm775_vm0, %v3575_v25 }
  0x3e   :  { %3424 = vmatmul.mubr.msk.bf16.gmra.mrb[16].mxu0 %vm775_vm0, %v3576_v26  ;;  %3488 = vmatmul.mubr.msk.bf16.gmra.mrb[16].mxu1 %vm775_vm0, %v3577_v27 }
  0x3f   :  { %3427 = vmatprep.mubr.msk.bf16.mxu0 %vm775_vm0, %v3578_v28  ;;  %3491 = vmatprep.mubr.msk.bf16.mxu1 %vm775_vm0, %v3579_v29 }
  0x46   :  { %3428 = vmatmul.mubr.msk.bf16.gmra.mrb[20].mxu0 %vm775_vm0, %v3580_v30  ;;  %3492 = vmatmul.mubr.msk.bf16.gmra.mrb[20].mxu1 %vm775_vm0, %v3581_v31 }
  0x47   :  { %3431 = vmatprep.mubr.msk.bf16.mxu0 %vm775_vm0, %v3582_v32  ;;  %3495 = vmatprep.mubr.msk.bf16.mxu1 %vm775_vm0, %v3583_v33 }
  0x4e   :  { %3432 = vmatmul.mubr.msk.bf16.gmra.mrb[24].mxu0 %vm775_vm0, %v3584_v34  ;;  %3496 = vmatmul.mubr.msk.bf16.gmra.mrb[24].mxu1 %vm775_vm0, %v3585_v35 }
  0x4f   :  { %3435 = vmatprep.mubr.msk.bf16.mxu0 %vm775_vm0, %v3586_v36  ;;  %3499 = vmatprep.mubr.msk.bf16.mxu1 %vm775_vm0, %v3587_v37 }
  0x56   :  { %3436 = vmatmul.mubr.msk.bf16.gmra.mrb[28].mxu0 %vm775_vm0, %v3588_v38  ;;  %3500 = vmatmul.mubr.msk.bf16.gmra.mrb[28].mxu1 %vm775_vm0, %v3589_v39 }
  0x57   :  { %3439 = vmatprep.mubr.msk.bf16.mxu0 %vm775_vm0, %v3590_v40  ;;  %3503 = vmatprep.mubr.msk.bf16.mxu1 %vm775_vm0, %v3591_v41 }
  0x5e   :  { %3440 = vmatmul.mubr.msk.bf16.gmra.mrb[32].mxu0 %vm775_vm0, %v3592_v42  ;;  %3504 = vmatmul.mubr.msk.bf16.gmra.mrb[32].mxu1 %vm775_vm0, %v3593_v43 }
  0x5f   :  { %3443 = vmatprep.mubr.msk.bf16.mxu0 %vm775_vm0, %v3594_v44  ;;  %3507 = vmatprep.mubr.msk.bf16.mxu1 %vm775_vm0, %v3595_v45 }
  0x66   :  { %3444 = vmatmul.mubr.msk.bf16.gmra.mrb[36].mxu0 %vm775_vm0, %v3596_v46  ;;  %3508 = vmatmul.mubr.msk.bf16.gmra.mrb[36].mxu1 %vm775_vm0, %v3597_v47 }
  0x67   :  { %3447 = vmatprep.mubr.msk.bf16.mxu0 %vm775_vm0, %v3598_v48  ;;  %3511 = vmatprep.mubr.msk.bf16.mxu1 %vm775_vm0, %v3599_v49 }
  0x6e   :  { %3448 = vmatmul.mubr.msk.bf16.gmra.mrb[40].mxu0 %vm775_vm0, %v3600_v50  ;;  %3512 = vmatmul.mubr.msk.bf16.gmra.mrb[40].mxu1 %vm775_vm0, %v3601_v51 }
  0x6f   :  { %3451 = vmatprep.mubr.msk.bf16.mxu0 %vm775_vm0, %v3602_v52  ;;  %3515 = vmatprep.mubr.msk.bf16.mxu1 %vm775_vm0, %v3603_v53 }
  0x76   :  { %3452 = vmatmul.mubr.msk.bf16.gmra.mrb[44].mxu0 %vm775_vm0, %v3604_v54  ;;  %3516 = vmatmul.mubr.msk.bf16.gmra.mrb[44].mxu1 %vm775_vm0, %v3605_v55 }
  0x77   :  { %3455 = vmatprep.mubr.msk.bf16.mxu0 %vm775_vm0, %v3606_v56  ;;  %3519 = vmatprep.mubr.msk.bf16.mxu1 %vm775_vm0, %v3607_v57 }
  0x7e   :  { %3456 = vmatmul.mubr.msk.bf16.gmra.mrb[48].mxu0 %vm775_vm0, %v3608_v58  ;;  %3520 = vmatmul.mubr.msk.bf16.gmra.mrb[48].mxu1 %vm775_vm0, %v3609_v59 }
  0x7f   :  { %3459 = vmatprep.mubr.msk.bf16.mxu0 %vm775_vm0, %v3610_v60  ;;  %3523 = vmatprep.mubr.msk.bf16.mxu1 %vm775_vm0, %v3611_v61 }
  0x86   :  { %3460 = vmatmul.mubr.msk.bf16.gmra.mrb[52].mxu0 %vm775_vm0, %v3612_v62  ;;  %3524 = vmatmul.mubr.msk.bf16.gmra.mrb[52].mxu1 %vm775_vm0, %v3613_v63 }
  0x87   :  { %3463 = vmatprep.mubr.msk.bf16.mxu0 %vm775_vm0, %v3614_v0  ;;  %3527 = vmatprep.mubr.msk.bf16.mxu1 %vm775_vm0, %v3615_v1 }
  0x8e   :  { %3464 = vmatmul.mubr.msk.bf16.gmra.mrb[56].mxu0 %vm775_vm0, %v3616_v2  ;;  %3528 = vmatmul.mubr.msk.bf16.gmra.mrb[56].mxu1 %vm775_vm0, %v3617_v3 }
  0x8f   :  { %3467 = vmatprep.mubr.msk.bf16.mxu0 %vm775_vm0, %v3618_v4  ;;  %3531 = vmatprep.mubr.msk.bf16.mxu1 %vm775_vm0, %v3619_v5 }
  0x96   :  { %3468 = vmatmul.mubr.msk.bf16.gmra.mrb[60].mxu0 %vm775_vm0, %v3620_v6  ;;  %3532 = vmatmul.mubr.msk.bf16.gmra.mrb[60].mxu1 %vm775_vm0, %v3621_v7 }
  0xf1   :  { %v3409_v8 = vpop.f32.mrb[0].mxu0  ;;  %v3473_v9 = vpop.f32.mrb[0].mxu1 }
  0xf2   :  { %v1006_v10 = vpop.f32.mrb[1].mxu0  ;;  %v1262_v11 = vpop.f32.mrb[1].mxu1 }
  0xf3   :  { %v3410_v12 = vpop.f32.mrb[2].mxu0  ;;  %v3474_v13 = vpop.f32.mrb[2].mxu1 }
  0xf4   :  { %v2947_v14 = vpack.c.bf16 %v3410_v12, %v3409_v8  ;;  %v3107_v15 = vpack.c.bf16 %v3474_v13, %v3473_v9  ;;  %v1009_v16 = vpop.f32.mrb[3].mxu0  ;;  %v1265_v17 = vpop.f32.mrb[3].mxu1 }
  0xf5   :  { %v2942_v18 = vpack.c.bf16 %v1009_v16, %v1006_v10  ;;  %v3102_v19 = vpack.c.bf16 %v1265_v17, %v1262_v11 }
  0xf6   :  { %3259 = vst [vmem:[%s4108_s2 + $0x8] sm:$0xff] %v2947_v14   ;;  %3291 = vst [vmem:[%s4108_s2 + $0x108] sm:$0xff] %v3107_v15  }
  0xf7   :  { %2943 = vst [vmem:[%s4108_s2] sm:$0xff] %v2942_v18   ;;  %3290 = vst [vmem:[%s4108_s2 + $0x100] sm:$0xff] %v3102_v19  }
  0xf9   :  { %v3413_v20 = vpop.f32.mrb[4].mxu0  ;;  %v3477_v21 = vpop.f32.mrb[4].mxu1 }
  0xfa   :  { %v1022_v22 = vpop.f32.mrb[5].mxu0  ;;  %v1278_v23 = vpop.f32.mrb[5].mxu1 }
  0xfb   :  { %v3414_v24 = vpop.f32.mrb[6].mxu0  ;;  %v3478_v25 = vpop.f32.mrb[6].mxu1 }
  0xfc   :  { %v2957_v26 = vpack.c.bf16 %v3414_v24, %v3413_v20  ;;  %v3117_v27 = vpack.c.bf16 %v3478_v25, %v3477_v21  ;;  %v1025_v28 = vpop.f32.mrb[7].mxu0  ;;  %v1281_v29 = vpop.f32.mrb[7].mxu1 }
  0xfd   :  { %v2952_v30 = vpack.c.bf16 %v1025_v28, %v1022_v22  ;;  %v3112_v31 = vpack.c.bf16 %v1281_v29, %v1278_v23 }
  0xfe   :  { %3261 = vst [vmem:[%s4108_s2 + $0x18] sm:$0xff] %v2957_v26   ;;  %3293 = vst [vmem:[%s4108_s2 + $0x118] sm:$0xff] %v3117_v27  }
  0xff   :  { %3260 = vst [vmem:[%s4108_s2 + $0x10] sm:$0xff] %v2952_v30   ;;  %3292 = vst [vmem:[%s4108_s2 + $0x110] sm:$0xff] %v3112_v31  }
 0x101   :  { %v3417_v32 = vpop.f32.mrb[8].mxu0  ;;  %v3481_v33 = vpop.f32.mrb[8].mxu1 }
 0x102   :  { %v1038_v34 = vpop.f32.mrb[9].mxu0  ;;  %v1294_v35 = vpop.f32.mrb[9].mxu1 }
 0x103   :  { %v3418_v36 = vpop.f32.mrb[10].mxu0  ;;  %v3482_v37 = vpop.f32.mrb[10].mxu1 }
 0x104   :  { %v2967_v38 = vpack.c.bf16 %v3418_v36, %v3417_v32  ;;  %v3127_v39 = vpack.c.bf16 %v3482_v37, %v3481_v33  ;;  %v1041_v40 = vpop.f32.mrb[11].mxu0  ;;  %v1297_v41 = vpop.f32.mrb[11].mxu1 }
 0x105   :  { %v2962_v42 = vpack.c.bf16 %v1041_v40, %v1038_v34  ;;  %v3122_v43 = vpack.c.bf16 %v1297_v41, %v1294_v35 }
 0x106   :  { %3263 = vst [vmem:[%s4108_s2 + $0x28] sm:$0xff] %v2967_v38   ;;  %3295 = vst [vmem:[%s4108_s2 + $0x128] sm:$0xff] %v3127_v39  }
 0x107   :  { %3262 = vst [vmem:[%s4108_s2 + $0x20] sm:$0xff] %v2962_v42   ;;  %3294 = vst [vmem:[%s4108_s2 + $0x120] sm:$0xff] %v3122_v43  }
 0x109   :  { %v3421_v44 = vpop.f32.mrb[12].mxu0  ;;  %v3485_v45 = vpop.f32.mrb[12].mxu1 }
 0x10a   :  { %v1054_v46 = vpop.f32.mrb[13].mxu0  ;;  %v1310_v47 = vpop.f32.mrb[13].mxu1 }
 0x10b   :  { %v3422_v48 = vpop.f32.mrb[14].mxu0  ;;  %v3486_v49 = vpop.f32.mrb[14].mxu1 }
 0x10c   :  { %v2977_v50 = vpack.c.bf16 %v3422_v48, %v3421_v44  ;;  %v3137_v51 = vpack.c.bf16 %v3486_v49, %v3485_v45  ;;  %v1057_v52 = vpop.f32.mrb[15].mxu0  ;;  %v1313_v53 = vpop.f32.mrb[15].mxu1 }
 0x10d   :  { %v2972_v54 = vpack.c.bf16 %v1057_v52, %v1054_v46  ;;  %v3132_v55 = vpack.c.bf16 %v1313_v53, %v1310_v47 }
 0x10e   :  { %3265 = vst [vmem:[%s4108_s2 + $0x38] sm:$0xff] %v2977_v50   ;;  %3297 = vst [vmem:[%s4108_s2 + $0x138] sm:$0xff] %v3137_v51  }
 0x10f   :  { %3264 = vst [vmem:[%s4108_s2 + $0x30] sm:$0xff] %v2972_v54   ;;  %3296 = vst [vmem:[%s4108_s2 + $0x130] sm:$0xff] %v3132_v55  }
 0x111   :  { %v3425_v56 = vpop.f32.mrb[16].mxu0  ;;  %v3489_v57 = vpop.f32.mrb[16].mxu1 }
 0x112   :  { %v1070_v58 = vpop.f32.mrb[17].mxu0  ;;  %v1326_v59 = vpop.f32.mrb[17].mxu1 }
 0x113   :  { %v3426_v60 = vpop.f32.mrb[18].mxu0  ;;  %v3490_v61 = vpop.f32.mrb[18].mxu1 }
 0x114   :  { %v2987_v62 = vpack.c.bf16 %v3426_v60, %v3425_v56  ;;  %v3147_v63 = vpack.c.bf16 %v3490_v61, %v3489_v57  ;;  %v1073_v0 = vpop.f32.mrb[19].mxu0  ;;  %v1329_v1 = vpop.f32.mrb[19].mxu1 }
 0x115   :  { %v2982_v2 = vpack.c.bf16 %v1073_v0, %v1070_v58  ;;  %v3142_v3 = vpack.c.bf16 %v1329_v1, %v1326_v59 }
 0x116   :  { %3267 = vst [vmem:[%s4108_s2 + $0x48] sm:$0xff] %v2987_v62   ;;  %3299 = vst [vmem:[%s4108_s2 + $0x148] sm:$0xff] %v3147_v63  }
 0x117   :  { %3266 = vst [vmem:[%s4108_s2 + $0x40] sm:$0xff] %v2982_v2   ;;  %3298 = vst [vmem:[%s4108_s2 + $0x140] sm:$0xff] %v3142_v3  }
 0x119   :  { %v3429_v4 = vpop.f32.mrb[20].mxu0  ;;  %v3493_v5 = vpop.f32.mrb[20].mxu1 }
 0x11a   :  { %v1086_v6 = vpop.f32.mrb[21].mxu0  ;;  %v1342_v7 = vpop.f32.mrb[21].mxu1 }
 0x11b   :  { %v3430_v8 = vpop.f32.mrb[22].mxu0  ;;  %v3494_v9 = vpop.f32.mrb[22].mxu1 }
 0x11c   :  { %v2997_v10 = vpack.c.bf16 %v3430_v8, %v3429_v4  ;;  %v3157_v11 = vpack.c.bf16 %v3494_v9, %v3493_v5  ;;  %v1089_v12 = vpop.f32.mrb[23].mxu0  ;;  %v1345_v13 = vpop.f32.mrb[23].mxu1 }
 0x11d   :  { %v2992_v14 = vpack.c.bf16 %v1089_v12, %v1086_v6  ;;  %v3152_v15 = vpack.c.bf16 %v1345_v13, %v1342_v7 }
 0x11e   :  { %3269 = vst [vmem:[%s4108_s2 + $0x58] sm:$0xff] %v2997_v10   ;;  %3301 = vst [vmem:[%s4108_s2 + $0x158] sm:$0xff] %v3157_v11  }
 0x11f   :  { %3268 = vst [vmem:[%s4108_s2 + $0x50] sm:$0xff] %v2992_v14   ;;  %3300 = vst [vmem:[%s4108_s2 + $0x150] sm:$0xff] %v3152_v15  }
 0x121   :  { %v3433_v16 = vpop.f32.mrb[24].mxu0  ;;  %v3497_v17 = vpop.f32.mrb[24].mxu1 }
 0x122   :  { %v1102_v18 = vpop.f32.mrb[25].mxu0  ;;  %v1358_v19 = vpop.f32.mrb[25].mxu1 }
 0x123   :  { %v3434_v20 = vpop.f32.mrb[26].mxu0  ;;  %v3498_v21 = vpop.f32.mrb[26].mxu1 }
 0x124   :  { %v3007_v22 = vpack.c.bf16 %v3434_v20, %v3433_v16  ;;  %v3167_v23 = vpack.c.bf16 %v3498_v21, %v3497_v17  ;;  %v1105_v24 = vpop.f32.mrb[27].mxu0  ;;  %v1361_v25 = vpop.f32.mrb[27].mxu1 }
 0x125   :  { %v3002_v26 = vpack.c.bf16 %v1105_v24, %v1102_v18  ;;  %v3162_v27 = vpack.c.bf16 %v1361_v25, %v1358_v19 }
 0x126   :  { %3271 = vst [vmem:[%s4108_s2 + $0x68] sm:$0xff] %v3007_v22   ;;  %3303 = vst [vmem:[%s4108_s2 + $0x168] sm:$0xff] %v3167_v23  }
 0x127   :  { %3270 = vst [vmem:[%s4108_s2 + $0x60] sm:$0xff] %v3002_v26   ;;  %3302 = vst [vmem:[%s4108_s2 + $0x160] sm:$0xff] %v3162_v27  }
 0x129   :  { %v3437_v28 = vpop.f32.mrb[28].mxu0  ;;  %v3501_v29 = vpop.f32.mrb[28].mxu1 }
 0x12a   :  { %v1118_v30 = vpop.f32.mrb[29].mxu0  ;;  %v1374_v31 = vpop.f32.mrb[29].mxu1 }
 0x12b   :  { %v3438_v32 = vpop.f32.mrb[30].mxu0  ;;  %v3502_v33 = vpop.f32.mrb[30].mxu1 }
 0x12c   :  { %v3017_v34 = vpack.c.bf16 %v3438_v32, %v3437_v28  ;;  %v3177_v35 = vpack.c.bf16 %v3502_v33, %v3501_v29  ;;  %v1121_v36 = vpop.f32.mrb[31].mxu0  ;;  %v1377_v37 = vpop.f32.mrb[31].mxu1 }
 0x12d   :  { %v3012_v38 = vpack.c.bf16 %v1121_v36, %v1118_v30  ;;  %v3172_v39 = vpack.c.bf16 %v1377_v37, %v1374_v31 }
 0x12e   :  { %3273 = vst [vmem:[%s4108_s2 + $0x78] sm:$0xff] %v3017_v34   ;;  %3305 = vst [vmem:[%s4108_s2 + $0x178] sm:$0xff] %v3177_v35  }
 0x12f   :  { %3272 = vst [vmem:[%s4108_s2 + $0x70] sm:$0xff] %v3012_v38   ;;  %3304 = vst [vmem:[%s4108_s2 + $0x170] sm:$0xff] %v3172_v39  }
 0x131   :  { %v3441_v40 = vpop.f32.mrb[32].mxu0  ;;  %v3505_v41 = vpop.f32.mrb[32].mxu1 }
 0x132   :  { %v1134_v42 = vpop.f32.mrb[33].mxu0  ;;  %v1390_v43 = vpop.f32.mrb[33].mxu1 }
 0x133   :  { %v3442_v44 = vpop.f32.mrb[34].mxu0  ;;  %v3506_v45 = vpop.f32.mrb[34].mxu1 }
 0x134   :  { %v3027_v46 = vpack.c.bf16 %v3442_v44, %v3441_v40  ;;  %v3187_v47 = vpack.c.bf16 %v3506_v45, %v3505_v41  ;;  %v1137_v48 = vpop.f32.mrb[35].mxu0  ;;  %v1393_v49 = vpop.f32.mrb[35].mxu1 }
 0x135   :  { %v3022_v50 = vpack.c.bf16 %v1137_v48, %v1134_v42  ;;  %v3182_v51 = vpack.c.bf16 %v1393_v49, %v1390_v43 }
 0x136   :  { %3275 = vst [vmem:[%s4108_s2 + $0x88] sm:$0xff] %v3027_v46   ;;  %3307 = vst [vmem:[%s4108_s2 + $0x188] sm:$0xff] %v3187_v47  }
 0x137   :  { %3274 = vst [vmem:[%s4108_s2 + $0x80] sm:$0xff] %v3022_v50   ;;  %3306 = vst [vmem:[%s4108_s2 + $0x180] sm:$0xff] %v3182_v51  }
 0x139   :  { %v3445_v52 = vpop.f32.mrb[36].mxu0  ;;  %v3509_v53 = vpop.f32.mrb[36].mxu1 }
 0x13a   :  { %v1150_v54 = vpop.f32.mrb[37].mxu0  ;;  %v1406_v55 = vpop.f32.mrb[37].mxu1 }
 0x13b   :  { %v3446_v56 = vpop.f32.mrb[38].mxu0  ;;  %v3510_v57 = vpop.f32.mrb[38].mxu1 }
 0x13c   :  { %v3037_v58 = vpack.c.bf16 %v3446_v56, %v3445_v52  ;;  %v3197_v59 = vpack.c.bf16 %v3510_v57, %v3509_v53  ;;  %v1153_v60 = vpop.f32.mrb[39].mxu0  ;;  %v1409_v61 = vpop.f32.mrb[39].mxu1 }
 0x13d   :  { %v3032_v62 = vpack.c.bf16 %v1153_v60, %v1150_v54  ;;  %v3192_v63 = vpack.c.bf16 %v1409_v61, %v1406_v55 }
 0x13e   :  { %3277 = vst [vmem:[%s4108_s2 + $0x98] sm:$0xff] %v3037_v58   ;;  %3309 = vst [vmem:[%s4108_s2 + $0x198] sm:$0xff] %v3197_v59  }
 0x13f   :  { %3276 = vst [vmem:[%s4108_s2 + $0x90] sm:$0xff] %v3032_v62   ;;  %3308 = vst [vmem:[%s4108_s2 + $0x190] sm:$0xff] %v3192_v63  }
 0x141   :  { %v3449_v0 = vpop.f32.mrb[40].mxu0  ;;  %v3513_v1 = vpop.f32.mrb[40].mxu1 }
 0x142   :  { %v1166_v2 = vpop.f32.mrb[41].mxu0  ;;  %v1422_v3 = vpop.f32.mrb[41].mxu1 }
 0x143   :  { %v3450_v4 = vpop.f32.mrb[42].mxu0  ;;  %v3514_v5 = vpop.f32.mrb[42].mxu1 }
 0x144   :  { %v3047_v6 = vpack.c.bf16 %v3450_v4, %v3449_v0  ;;  %v3207_v7 = vpack.c.bf16 %v3514_v5, %v3513_v1  ;;  %v1169_v8 = vpop.f32.mrb[43].mxu0  ;;  %v1425_v9 = vpop.f32.mrb[43].mxu1 }
 0x145   :  { %v3042_v10 = vpack.c.bf16 %v1169_v8, %v1166_v2  ;;  %v3202_v11 = vpack.c.bf16 %v1425_v9, %v1422_v3 }
 0x146   :  { %3279 = vst [vmem:[%s4108_s2 + $0xa8] sm:$0xff] %v3047_v6   ;;  %3311 = vst [vmem:[%s4108_s2 + $0x1a8] sm:$0xff] %v3207_v7  }
 0x147   :  { %3278 = vst [vmem:[%s4108_s2 + $0xa0] sm:$0xff] %v3042_v10   ;;  %3310 = vst [vmem:[%s4108_s2 + $0x1a0] sm:$0xff] %v3202_v11  }
 0x149   :  { %v3453_v12 = vpop.f32.mrb[44].mxu0  ;;  %v3517_v13 = vpop.f32.mrb[44].mxu1 }
 0x14a   :  { %v1182_v14 = vpop.f32.mrb[45].mxu0  ;;  %v1438_v15 = vpop.f32.mrb[45].mxu1 }
 0x14b   :  { %v3454_v16 = vpop.f32.mrb[46].mxu0  ;;  %v3518_v17 = vpop.f32.mrb[46].mxu1 }
 0x14c   :  { %v3057_v18 = vpack.c.bf16 %v3454_v16, %v3453_v12  ;;  %v3217_v19 = vpack.c.bf16 %v3518_v17, %v3517_v13  ;;  %v1185_v20 = vpop.f32.mrb[47].mxu0  ;;  %v1441_v21 = vpop.f32.mrb[47].mxu1 }
 0x14d   :  { %v3052_v22 = vpack.c.bf16 %v1185_v20, %v1182_v14  ;;  %v3212_v23 = vpack.c.bf16 %v1441_v21, %v1438_v15 }
 0x14e   :  { %3281 = vst [vmem:[%s4108_s2 + $0xb8] sm:$0xff] %v3057_v18   ;;  %3313 = vst [vmem:[%s4108_s2 + $0x1b8] sm:$0xff] %v3217_v19  }
 0x14f   :  { %3280 = vst [vmem:[%s4108_s2 + $0xb0] sm:$0xff] %v3052_v22   ;;  %3312 = vst [vmem:[%s4108_s2 + $0x1b0] sm:$0xff] %v3212_v23  }
 0x151   :  { %v3457_v24 = vpop.f32.mrb[48].mxu0  ;;  %v3521_v25 = vpop.f32.mrb[48].mxu1 }
 0x152   :  { %v1198_v26 = vpop.f32.mrb[49].mxu0  ;;  %v1454_v27 = vpop.f32.mrb[49].mxu1 }
 0x153   :  { %v3458_v28 = vpop.f32.mrb[50].mxu0  ;;  %v3522_v29 = vpop.f32.mrb[50].mxu1 }
 0x154   :  { %v3067_v30 = vpack.c.bf16 %v3458_v28, %v3457_v24  ;;  %v3227_v31 = vpack.c.bf16 %v3522_v29, %v3521_v25  ;;  %v1201_v32 = vpop.f32.mrb[51].mxu0  ;;  %v1457_v33 = vpop.f32.mrb[51].mxu1 }
 0x155   :  { %v3062_v34 = vpack.c.bf16 %v1201_v32, %v1198_v26  ;;  %v3222_v35 = vpack.c.bf16 %v1457_v33, %v1454_v27 }
 0x156   :  { %3283 = vst [vmem:[%s4108_s2 + $0xc8] sm:$0xff] %v3067_v30   ;;  %3315 = vst [vmem:[%s4108_s2 + $0x1c8] sm:$0xff] %v3227_v31  }
 0x157   :  { %3282 = vst [vmem:[%s4108_s2 + $0xc0] sm:$0xff] %v3062_v34   ;;  %3314 = vst [vmem:[%s4108_s2 + $0x1c0] sm:$0xff] %v3222_v35  }
 0x159   :  { %v3461_v36 = vpop.f32.mrb[52].mxu0  ;;  %v3525_v37 = vpop.f32.mrb[52].mxu1 }
 0x15a   :  { %v1214_v38 = vpop.f32.mrb[53].mxu0  ;;  %v1470_v39 = vpop.f32.mrb[53].mxu1 }
 0x15b   :  { %v3462_v40 = vpop.f32.mrb[54].mxu0  ;;  %v3526_v41 = vpop.f32.mrb[54].mxu1 }
 0x15c   :  { %v3077_v42 = vpack.c.bf16 %v3462_v40, %v3461_v36  ;;  %v3237_v43 = vpack.c.bf16 %v3526_v41, %v3525_v37  ;;  %v1217_v44 = vpop.f32.mrb[55].mxu0  ;;  %v1473_v45 = vpop.f32.mrb[55].mxu1 }
 0x15d   :  { %v3072_v46 = vpack.c.bf16 %v1217_v44, %v1214_v38  ;;  %v3232_v47 = vpack.c.bf16 %v1473_v45, %v1470_v39 }
 0x15e   :  { %3285 = vst [vmem:[%s4108_s2 + $0xd8] sm:$0xff] %v3077_v42   ;;  %3317 = vst [vmem:[%s4108_s2 + $0x1d8] sm:$0xff] %v3237_v43  }
 0x15f   :  { %3284 = vst [vmem:[%s4108_s2 + $0xd0] sm:$0xff] %v3072_v46   ;;  %3316 = vst [vmem:[%s4108_s2 + $0x1d0] sm:$0xff] %v3232_v47  }
 0x161   :  { %v3465_v48 = vpop.f32.mrb[56].mxu0  ;;  %v3529_v49 = vpop.f32.mrb[56].mxu1 }
 0x162   :  { %v1230_v50 = vpop.f32.mrb[57].mxu0  ;;  %v1486_v51 = vpop.f32.mrb[57].mxu1 }
 0x163   :  { %v3466_v52 = vpop.f32.mrb[58].mxu0  ;;  %v3530_v53 = vpop.f32.mrb[58].mxu1 }
 0x164   :  { %v3087_v54 = vpack.c.bf16 %v3466_v52, %v3465_v48  ;;  %v3247_v55 = vpack.c.bf16 %v3530_v53, %v3529_v49  ;;  %v1233_v56 = vpop.f32.mrb[59].mxu0  ;;  %v1489_v57 = vpop.f32.mrb[59].mxu1 }
 0x165   :  { %v3082_v58 = vpack.c.bf16 %v1233_v56, %v1230_v50  ;;  %v3242_v59 = vpack.c.bf16 %v1489_v57, %v1486_v51 }
 0x166   :  { %3287 = vst [vmem:[%s4108_s2 + $0xe8] sm:$0xff] %v3087_v54   ;;  %3319 = vst [vmem:[%s4108_s2 + $0x1e8] sm:$0xff] %v3247_v55  }
 0x167   :  { %3286 = vst [vmem:[%s4108_s2 + $0xe0] sm:$0xff] %v3082_v58   ;;  %3318 = vst [vmem:[%s4108_s2 + $0x1e0] sm:$0xff] %v3242_v59  }
 0x169   :  { %v3469_v60 = vpop.f32.mrb[60].mxu0  ;;  %v3533_v61 = vpop.f32.mrb[60].mxu1 }
 0x16a   :  { %v1246_v62 = vpop.f32.mrb[61].mxu0  ;;  %v1502_v63 = vpop.f32.mrb[61].mxu1 }
 0x16b   :  { %v3470_v0 = vpop.f32.mrb[62].mxu0  ;;  %v3534_v1 = vpop.f32.mrb[62].mxu1 }
 0x16c   :  { %v3097_v2 = vpack.c.bf16 %v3470_v0, %v3469_v60  ;;  %v3257_v3 = vpack.c.bf16 %v3534_v1, %v3533_v61  ;;  %v1249_v4 = vpop.f32.mrb[63].mxu0  ;;  %v1505_v5 = vpop.f32.mrb[63].mxu1 }
 0x16d   :  { %v3092_v6 = vpack.c.bf16 %v1249_v4, %v1246_v62  ;;  %v3252_v7 = vpack.c.bf16 %v1505_v5, %v1502_v63 }
 0x16e   :  { %3289 = vst [vmem:[%s4108_s2 + $0xf8] sm:$0xff] %v3097_v2   ;;  %3321 = vst [vmem:[%s4108_s2 + $0x1f8] sm:$0xff] %v3257_v3  }
 0x16f   :  { %3288 = vst [vmem:[%s4108_s2 + $0xf0] sm:$0xff] %v3092_v6   ;;  %3320 = vst [vmem:[%s4108_s2 + $0x1f0] sm:$0xff] %v3252_v7  }

</bundles_post_ra>
